<compile_context>
chip_gen: v7x
topology: tpu7x:2x2x1
jax: 0.10.0
libtpu: 0.0.40
codegen_flags: <defaults>
</compile_context>

<pallas_src>
import functools

import numpy as np
import jax
import jax.numpy as jnp
from jax.experimental import pallas as pl
from jax.experimental.pallas import tpu as pltpu

C_IN, C_OUT, KH, KW = 32, 64, 3, 3
OUT_H, OUT_W = 5, 7
K_DIM = KH * KW * C_IN          # 288
OUT_HW = OUT_H * OUT_W          # 35


def _adaptive_bounds(in_size, out_size):
    # exact torch.nn.AdaptiveAvgPool2d window boundaries
    starts = [(i * in_size) // out_size for i in range(out_size)]
    ends = [-(-((i + 1) * in_size) // out_size) for i in range(out_size)]  # ceil
    return starts, ends


def _pool_count_matrix(h, w):
    """Shared per-image pool operands.

    Returns:
      counts : (35, h*w) f32 with 1.0 entries marking each adaptive window (MXU-friendly
               when cast to bf16 -- no rounding of the matrix entries).
      invcnt : (35, 1) f32 reciprocal window sizes, applied after the dot.
    """
    hs, he = _adaptive_bounds(h, OUT_H)
    ws, we = _adaptive_bounds(w, OUT_W)
    counts = np.zeros((OUT_HW, h * w), np.float32)
    invcnt = np.zeros((OUT_HW, 1), np.float32)
    for p in range(OUT_H):
        for q in range(OUT_W):
            row = p * OUT_W + q
            cnt = (he[p] - hs[p]) * (we[q] - ws[q])
            invcnt[row, 0] = 1.0 / cnt
            for r in range(hs[p], he[p]):
                for c in range(ws[q], we[q]):
                    counts[row, r * w + c] = 1.0
    return counts, invcnt


def _im2col(x_nchw):
    """NCHW -> NHWC, pad=1, 3x3 patches -> (N*H*W, KH*KW*C_IN); last axis ordered (ki, kj, c)."""
    n, c, h, w = x_nchw.shape
    xh = jnp.transpose(x_nchw, (0, 2, 3, 1))
    xp = jnp.pad(xh, ((0, 0), (1, 1), (1, 1), (0, 0)))
    cols = [xp[:, ki:ki + h, kj:kj + w, :] for ki in range(KH) for kj in range(KW)]
    return jnp.concatenate(cols, axis=-1).reshape(n * h * w, KH * KW * c)


def simplenet_kernel(px_ref, py_ref, w1_ref, w2_ref, b1_ref, b2_ref,
                     pool_ref, invcnt_ref, out_ref, *, test_add_relu):
    # per grid step (one image):
    #   px/py  : (H*W, 288) im2col patches (compute dtype)
    #   w1/w2  : (288, 64) flattened HWIO weights (compute dtype)
    #   b1/b2  : (1, 64) f32
    #   pool   : (35, H*W) adaptive-pool count matrix (1.0 entries, compute dtype)
    #   invcnt : (35, 1) f32 reciprocal window sizes
    #   out    : (1, 35, 64) f32
    conv_x = jnp.dot(px_ref[...], w1_ref[...],
                     preferred_element_type=jnp.float32) + b1_ref[...]
    conv_y = jnp.dot(py_ref[...], w2_ref[...],
                     preferred_element_type=jnp.float32) + b2_ref[...]
    conv_y = jnp.maximum(conv_y, 0.0)            # relu(conv2(y))
    z = conv_x + conv_y                          # torch.add
    if test_add_relu:
        z = jnp.maximum(z, 0.0)
    # adaptive avg pool: (35, H*W) @ (H*W, 64) count-sum on the MXU, then exact f32 1/cnt scale
    pooled = jnp.dot(pool_ref[...], z.astype(pool_ref.dtype),
                     preferred_element_type=jnp.float32)
    out_ref[0] = pooled * invcnt_ref[...]


@functools.partial(jax.jit, static_argnames=("test_add_relu", "compute_dtype"))
def simplenet_forward(x_nchw, y_nchw, w1_oihw, b1, w2_oihw, b2, *,
                      test_add_relu=True, compute_dtype=jnp.bfloat16):
    N, _, H, W = x_nchw.shape
    HW = H * W  # must be a multiple of 8 (it is for the 16x16 test shape)

    # cast BEFORE im2col: the 9x patch expansion happens at compute-dtype width
    px = _im2col(x_nchw.astype(compute_dtype))            # (N*H*W, 288)
    py = _im2col(y_nchw.astype(compute_dtype))
    # OIHW -> HWIO -> (288, 64); axis-0 ordering (ki, kj, c) matches _im2col
    w1f = jnp.transpose(w1_oihw.astype(compute_dtype), (2, 3, 1, 0)).reshape(K_DIM, C_OUT)
    w2f = jnp.transpose(w2_oihw.astype(compute_dtype), (2, 3, 1, 0)).reshape(K_DIM, C_OUT)

    counts_np, invcnt_np = _pool_count_matrix(H, W)
    pool = jnp.asarray(counts_np).astype(compute_dtype)   # (35, H*W), 1.0 entries
    invcnt = jnp.asarray(invcnt_np)                       # (35, 1) f32

    kernel = functools.partial(simplenet_kernel, test_add_relu=test_add_relu)
    out = pl.pallas_call(
        kernel,
        out_shape=jax.ShapeDtypeStruct((N, OUT_HW, C_OUT), jnp.float32),
        grid=(N,),
        in_specs=[
            pl.BlockSpec((HW, K_DIM), lambda n: (n, 0)),       # px, per image
            pl.BlockSpec((HW, K_DIM), lambda n: (n, 0)),       # py, per image
            pl.BlockSpec((K_DIM, C_OUT), lambda n: (0, 0)),    # w1 (shared)
            pl.BlockSpec((K_DIM, C_OUT), lambda n: (0, 0)),    # w2 (shared)
            pl.BlockSpec((1, C_OUT), lambda n: (0, 0)),        # b1
            pl.BlockSpec((1, C_OUT), lambda n: (0, 0)),        # b2
            pl.BlockSpec((OUT_HW, HW), lambda n: (0, 0)),      # pool counts (shared)
            pl.BlockSpec((OUT_HW, 1), lambda n: (0, 0)),       # 1/cnt (shared)
        ],
        out_specs=pl.BlockSpec((1, OUT_HW, C_OUT), lambda n: (n, 0, 0)),
        compiler_params=pltpu.CompilerParams(
            dimension_semantics=("parallel",)),                # v7x: shard images over 2 TCs
    )(px, py, w1f, w2f,
      b1.astype(jnp.float32).reshape(1, C_OUT),
      b2.astype(jnp.float32).reshape(1, C_OUT),
      pool, invcnt)
    # (N, 35, 64) rows ordered (p, q) -> (N, 5, 7, 64) -> NCHW to match PyTorch
    return jnp.transpose(out.reshape(N, OUT_H, OUT_W, C_OUT), (0, 3, 1, 2))


def ref_forward(x, y, w1, b1, w2, b2, *, test_add_relu=True):
    """Plain-JAX f32 reference (NCHW)."""
    dn = jax.lax.conv_dimension_numbers(x.shape, w1.shape, ("NCHW", "OIHW", "NCHW"))
    cx = jax.lax.conv_general_dilated(x, w1, (1, 1), "SAME", dimension_numbers=dn)
    cy = jax.lax.conv_general_dilated(y, w2, (1, 1), "SAME", dimension_numbers=dn)
    cx = cx + b1[None, :, None, None]
    cy = jnp.maximum(cy + b2[None, :, None, None], 0.0)
    z = cx + cy
    if test_add_relu:
        z = jnp.maximum(z, 0.0)
    N, C, H, W = z.shape
    counts, invcnt = _pool_count_matrix(H, W)
    pm = jnp.asarray(counts * invcnt)                     # (35, H*W) with 1/cnt entries
    pooled = jnp.einsum("pk,nck->ncp", pm, z.reshape(N, C, H * W))
    return pooled.reshape(N, C, OUT_H, OUT_W)


if __name__ == "__main__":
    TEST_ADD_RELU = True
    N, H, W = 2, 16, 16

    key = jax.random.PRNGKey(0)
    kx, ky, kw1, kb1, kw2, kb2 = jax.random.split(key, 6)
    x = jax.random.normal(kx, (N, C_IN, H, W), jnp.float32)
    y = jax.random.normal(ky, (N, C_IN, H, W), jnp.float32)
    # deterministic conv params (PyTorch OIHW convention)
    w1 = jax.random.normal(kw1, (C_OUT, C_IN, KH, KW), jnp.float32) * 0.05
    b1 = jax.random.normal(kb1, (C_OUT,), jnp.float32) * 0.05
    w2 = jax.random.normal(kw2, (C_OUT, C_IN, KH, KW), jnp.float32) * 0.05
    b2 = jax.random.normal(kb2, (C_OUT,), jnp.float32) * 0.05

    ref = jax.block_until_ready(ref_forward(x, y, w1, b1, w2, b2, test_add_relu=TEST_ADD_RELU))

    # 1) f32-operand run: tight correctness check of the kernel structure.
    out_f32 = jax.block_until_ready(
        simplenet_forward(x, y, w1, b1, w2, b2,
                          test_add_relu=TEST_ADD_RELU, compute_dtype=jnp.float32))
    assert out_f32.shape == (N, C_OUT, OUT_H, OUT_W), out_f32.shape
    assert bool(jnp.allclose(out_f32, ref, atol=2e-3, rtol=2e-3)), \
        float(jnp.max(jnp.abs(out_f32 - ref)))

    # 2) bf16-operand production path (v6e/v7x MXU-native, f32 accumulation): looser tolerance.
    out_bf16 = jax.block_until_ready(
        simplenet_forward(x, y, w1, b1, w2, b2,
                          test_add_relu=TEST_ADD_RELU, compute_dtype=jnp.bfloat16))
    assert out_bf16.shape == (N, C_OUT, OUT_H, OUT_W), out_bf16.shape
    assert bool(jnp.allclose(out_bf16, ref, atol=5e-2, rtol=5e-2)), \
        float(jnp.max(jnp.abs(out_bf16 - ref)))

    print("KERNEL_OK")
</pallas_src>

<mosaic_0001>
module attributes {stable_mosaic.version = 11 : i64} {
  func.func @simplenet_kernel(%arg0: i32, %arg1: memref<256x288xf32, #tpu.memory_space<vmem>>, %arg2: memref<256x288xf32, #tpu.memory_space<vmem>>, %arg3: memref<288x64xf32, #tpu.memory_space<vmem>>, %arg4: memref<288x64xf32, #tpu.memory_space<vmem>>, %arg5: memref<1x64xf32, #tpu.memory_space<vmem>>, %arg6: memref<1x64xf32, #tpu.memory_space<vmem>>, %arg7: memref<35x256xf32, #tpu.memory_space<vmem>>, %arg8: memref<35x1xf32, #tpu.memory_space<vmem>>, %arg9: memref<1x35x64xf32, #tpu.memory_space<vmem>>) attributes {dimension_semantics = [#tpu.dimension_semantics<parallel>], iteration_bounds = array<i64: 2>, scalar_prefetch = 0 : i64, scratch_operands = 0 : i64, tpu.core_type = #tpu.core_type<tc>, window_params = [{transform_indices = @transform_0, window_bounds = array<i64: 256, 288>}, {transform_indices = @transform_1, window_bounds = array<i64: 256, 288>}, {pipeline_mode = #tpu.pipeline_mode<synchronous>, transform_indices = @transform_2, window_bounds = array<i64: 288, 64>}, {pipeline_mode = #tpu.pipeline_mode<synchronous>, transform_indices = @transform_3, window_bounds = array<i64: 288, 64>}, {pipeline_mode = #tpu.pipeline_mode<synchronous>, transform_indices = @transform_4, window_bounds = array<i64: 1, 64>}, {pipeline_mode = #tpu.pipeline_mode<synchronous>, transform_indices = @transform_5, window_bounds = array<i64: 1, 64>}, {pipeline_mode = #tpu.pipeline_mode<synchronous>, transform_indices = @transform_6, window_bounds = array<i64: 35, 256>}, {pipeline_mode = #tpu.pipeline_mode<synchronous>, transform_indices = @transform_7, window_bounds = array<i64: 35, 1>}, {transform_indices = @transform_8, window_bounds = array<i64: 1, 35, 64>}]} {
    %c0 = arith.constant 0 : index
    %c0_0 = arith.constant 0 : index
    %0 = vector.load %arg1[%c0, %c0_0] : memref<256x288xf32, #tpu.memory_space<vmem>>, vector<256x288xf32>
    %c0_1 = arith.constant 0 : index
    %c0_2 = arith.constant 0 : index
    %1 = vector.load %arg3[%c0_1, %c0_2] : memref<288x64xf32, #tpu.memory_space<vmem>>, vector<288x64xf32>
    %cst = arith.constant dense<0.000000e+00> : vector<256x64xf32>
    %2 = tpu.matmul %0, %1, %cst {dimension_numbers = #tpu.dot_dimension_numbers<[1], [0], [0], [1], [0, 0, 1, 1], [], []>} : vector<256x288xf32>, vector<288x64xf32>, vector<256x64xf32> -> vector<256x64xf32>
    %c0_3 = arith.constant 0 : index
    %c0_4 = arith.constant 0 : index
    %3 = vector.load %arg5[%c0_3, %c0_4] : memref<1x64xf32, #tpu.memory_space<vmem>>, vector<1x64xf32>
    %4 = vector.broadcast %3 : vector<1x64xf32> to vector<256x64xf32>
    %5 = arith.addf %2, %4 : vector<256x64xf32>
    %c0_5 = arith.constant 0 : index
    %c0_6 = arith.constant 0 : index
    %6 = vector.load %arg2[%c0_5, %c0_6] : memref<256x288xf32, #tpu.memory_space<vmem>>, vector<256x288xf32>
    %c0_7 = arith.constant 0 : index
    %c0_8 = arith.constant 0 : index
    %7 = vector.load %arg4[%c0_7, %c0_8] : memref<288x64xf32, #tpu.memory_space<vmem>>, vector<288x64xf32>
    %cst_9 = arith.constant dense<0.000000e+00> : vector<256x64xf32>
    %8 = tpu.matmul %6, %7, %cst_9 {dimension_numbers = #tpu.dot_dimension_numbers<[1], [0], [0], [1], [0, 0, 1, 1], [], []>} : vector<256x288xf32>, vector<288x64xf32>, vector<256x64xf32> -> vector<256x64xf32>
    %c0_10 = arith.constant 0 : index
    %c0_11 = arith.constant 0 : index
    %9 = vector.load %arg6[%c0_10, %c0_11] : memref<1x64xf32, #tpu.memory_space<vmem>>, vector<1x64xf32>
    %10 = vector.broadcast %9 : vector<1x64xf32> to vector<256x64xf32>
    %11 = arith.addf %8, %10 : vector<256x64xf32>
    %cst_12 = arith.constant 0.000000e+00 : f32
    %12 = vector.broadcast %cst_12 : f32 to vector<256x64xf32>
    %13 = arith.maximumf %11, %12 : vector<256x64xf32>
    %14 = arith.addf %5, %13 : vector<256x64xf32>
    %cst_13 = arith.constant 0.000000e+00 : f32
    %15 = vector.broadcast %cst_13 : f32 to vector<256x64xf32>
    %16 = arith.maximumf %14, %15 : vector<256x64xf32>
    %c0_14 = arith.constant 0 : index
    %c0_15 = arith.constant 0 : index
    %17 = vector.load %arg7[%c0_14, %c0_15] : memref<35x256xf32, #tpu.memory_space<vmem>>, vector<35x256xf32>
    %cst_16 = arith.constant dense<0.000000e+00> : vector<35x64xf32>
    %18 = tpu.matmul %17, %16, %cst_16 {dimension_numbers = #tpu.dot_dimension_numbers<[1], [0], [0], [1], [0, 0, 1, 1], [], []>} : vector<35x256xf32>, vector<256x64xf32>, vector<35x64xf32> -> vector<35x64xf32>
    %c0_17 = arith.constant 0 : index
    %c0_18 = arith.constant 0 : index
    %19 = vector.load %arg8[%c0_17, %c0_18] : memref<35x1xf32, #tpu.memory_space<vmem>>, vector<35x1xf32>
    %20 = vector.broadcast %19 : vector<35x1xf32> to vector<35x64xf32>
    %21 = arith.mulf %18, %20 : vector<35x64xf32>
    %c0_19 = arith.constant 0 : index
    %c0_20 = arith.constant 0 : index
    %c0_21 = arith.constant 0 : index
    %22 = vector.load %arg9[%c0_19, %c0_20, %c0_21] : memref<1x35x64xf32, #tpu.memory_space<vmem>>, vector<1x35x64xf32>
    %23 = vector.shape_cast %22 : vector<1x35x64xf32> to vector<35x64xf32>
    %24 = vector.shape_cast %21 : vector<35x64xf32> to vector<1x35x64xf32>
    tpu.vector_store %arg9[%c0_19, %c0_20, %c0_21], %24 {strides = array<i32>} : memref<1x35x64xf32, #tpu.memory_space<vmem>>, vector<1x35x64xf32>,
    return
  }
  func.func @transform_0(%arg0: i32) -> (i32, i32) {
    %c0_i32 = arith.constant 0 : i32
    %c0_i32_0 = arith.constant 0 : i32
    return %arg0, %c0_i32 : i32, i32
  }
  func.func @transform_1(%arg0: i32) -> (i32, i32) {
    %c0_i32 = arith.constant 0 : i32
    %c0_i32_0 = arith.constant 0 : i32
    return %arg0, %c0_i32 : i32, i32
  }
  func.func @transform_2(%arg0: i32) -> (i32, i32) {
    %c0_i32 = arith.constant 0 : i32
    %c0_i32_0 = arith.constant 0 : i32
    %c0_i32_1 = arith.constant 0 : i32
    return %c0_i32, %c0_i32_0 : i32, i32
  }
  func.func @transform_3(%arg0: i32) -> (i32, i32) {
    %c0_i32 = arith.constant 0 : i32
    %c0_i32_0 = arith.constant 0 : i32
    %c0_i32_1 = arith.constant 0 : i32
    return %c0_i32, %c0_i32_0 : i32, i32
  }
  func.func @transform_4(%arg0: i32) -> (i32, i32) {
    %c0_i32 = arith.constant 0 : i32
    %c0_i32_0 = arith.constant 0 : i32
    %c0_i32_1 = arith.constant 0 : i32
    return %c0_i32, %c0_i32_0 : i32, i32
  }
  func.func @transform_5(%arg0: i32) -> (i32, i32) {
    %c0_i32 = arith.constant 0 : i32
    %c0_i32_0 = arith.constant 0 : i32
    %c0_i32_1 = arith.constant 0 : i32
    return %c0_i32, %c0_i32_0 : i32, i32
  }
  func.func @transform_6(%arg0: i32) -> (i32, i32) {
    %c0_i32 = arith.constant 0 : i32
    %c0_i32_0 = arith.constant 0 : i32
    %c0_i32_1 = arith.constant 0 : i32
    return %c0_i32, %c0_i32_0 : i32, i32
  }
  func.func @transform_7(%arg0: i32) -> (i32, i32) {
    %c0_i32 = arith.constant 0 : i32
    %c0_i32_0 = arith.constant 0 : i32
    %c0_i32_1 = arith.constant 0 : i32
    return %c0_i32, %c0_i32_0 : i32, i32
  }
  func.func @transform_8(%arg0: i32) -> (i32, i32, i32) {
    %c0_i32 = arith.constant 0 : i32
    %c0_i32_0 = arith.constant 0 : i32
    %c0_i32_1 = arith.constant 0 : i32
    return %arg0, %c0_i32, %c0_i32_0 : i32, i32, i32
  }
}

</mosaic_0001>

<bundles_post_ra>
// kernel: simplenet_forward.1
= control target key start
LH: loop header
LB: loop body
LE: loop exit
PB: predicated region body
PF: predicated region fallthrough
CT: control target
= control target key end

     0   :  { %s2534_s27 = smov 0   ;;  %s3494_s0 = inlined_call_operand.vmem [shape: f32[512,288], index: 0, kind: input, shape index: {}]   ;;  %s3495_s1 = inlined_call_operand.vmem [shape: f32[512,288], index: 1, kind: input, shape index: {}]   ;;  %s3496_s2 = inlined_call_operand.vmem [shape: f32[288,64], index: 2, kind: input, shape index: {}]   ;;  %s3497_s3 = inlined_call_operand.vmem [shape: f32[288,64], index: 3, kind: input, shape index: {}]   ;;  %s3498_s4 = inlined_call_operand.vmem [shape: f32[1,64], index: 4, kind: input, shape index: {}]   ;;  %s3499_s5 = inlined_call_operand.vmem [shape: f32[1,64], index: 5, kind: input, shape index: {}]   ;;  %s3500_s6 = inlined_call_operand.vmem [shape: f32[35,256], index: 6, kind: input, shape index: {}]   ;;  %s3501_s7 = inlined_call_operand.vmem [shape: f32[35,1], index: 7, kind: input, shape index: {}]   ;;  %s3502_s8 = inlined_call_operand.vmem [shape: f32[2,35,64], index: 8, kind: output, shape index: {}]  }
   0x1 LB: > { %s2540_s28 = sadd.s32 4294967295, %s2485_s27   ;;  %p2016_p0 = scmp.ge.s32.totalorder %s2485_s27, 1  ;;  %s2485_s27 = sphi %s2534_s27, %s18_s27  }
   0x2   : > { %p276_p1 = scmp.lt.s32.totalorder %s2485_s27, 3 }
   0x4   : > { %p277_p2 = pnand %p2016_p0, %p276_p1 }
   0x6   : > { %280 = sbr.rel (%p277_p2) target bundleno = 728 (0x2d8), region = 52 }
   0xd   : > { %v432_v0 = vld [vmem:[%s3496_s2] sm:$0xff]  ;;  %v433_v1 = vld [vmem:[%s3496_s2 + $0x8] sm:$0xff]  ;;  %v434_v2 = vld [vmem:[%s3496_s2 + $0x10] sm:$0xff]  ;;  %s2017_s13 = sshll.u32 %s2540_s28, 5  ;;  %v2487_v3 = vmov 0.0|0.0   ;;  %vm475_vm0 = vcmask 261120  }
   0xe   : > { %2321 = vmatprep.subr.bf16.mxu0 %v2487_v3  ;;  %v2322_v4 = vpack.c.bf16 %v433_v1, %v432_v0  ;;  %v435_v5 = vld [vmem:[%s3496_s2 + $0x18] sm:$0xff]  ;;  %p318_p3 = scmp.lt.s32.totalorder %s2017_s13, 63  ;;  %v436_v7 = vld [vmem:[%s3496_s2 + $0x20] sm:$0xff]  ;;  %v437_v8 = vld [vmem:[%s3496_s2 + $0x28] sm:$0xff]  ;;  %p331_p4 = scmp.lt.s32.totalorder %s2540_s28, 1  ;;  %vm1938_vm1 = vcmask 523264  }
   0xf   : > { %v2325_v6 = vpack.c.bf16 %v435_v5, %v434_v2  ;;  %v2328_v9 = vpack.c.bf16 %v437_v8, %v436_v7  ;;  %v438_v10 = vld [vmem:[%s3496_s2 + $0x30] sm:$0xff]  ;;  %v439_v11 = vld [vmem:[%s3496_s2 + $0x38] sm:$0xff]  ;;  %v464_v12 = vld [vmem:[%s3496_s2 + $0x100] sm:$0xff]  ;;  %vm1943_vm2 = vcmask 518144  }
  0x10   : > { %2323 = vmatpush1.bf16.msra.mxu0 %v2322_v4  ;;  %s3530_s13 = smov (!%p318_p3, %s2017_s13), 63  ;;  %v465_v13 = vld [vmem:[%s3496_s2 + $0x108] sm:$0xff]  ;;  %v466_v15 = vld [vmem:[%s3496_s2 + $0x110] sm:$0xff]  ;;  %v2331_v16 = vpack.c.bf16 %v439_v11, %v438_v10  ;;  %v440_v17 = vld [vmem:[%s3496_s2 + $0x40] sm:$0xff]  ;;  %s3532_s28 = smov (!%p331_p4, %s2540_s28), 1 }
  0x11   : > { %2324 = vmatprep.subr.bf16.mxu0 %v2487_v3  ;;  %s2465_s20 = smul.u32 24, %s3530_s13  ;;  %v2369_v14 = vpack.c.bf16 %v465_v13, %v464_v12  ;;  %v467_v18 = vld [vmem:[%s3496_s2 + $0x118] sm:$0xff]  ;;  %v441_v19 = vld [vmem:[%s3496_s2 + $0x48] sm:$0xff]  ;;  %v1118_v23 = vld [vmem:[%s3497_s3] sm:$0xff] }
  0x12   : > { %v2373_v20 = vpack.c.bf16 %v467_v18, %v466_v15  ;;  %v1119_v24 = vld [vmem:[%s3497_s3 + $0x8] sm:$0xff]  ;;  %v2334_v25 = vpack.c.bf16 %v441_v19, %v440_v17  ;;  %v442_v26 = vld [vmem:[%s3496_s2 + $0x50] sm:$0xff]  ;;  %v443_v27 = vld [vmem:[%s3496_s2 + $0x58] sm:$0xff]  ;;  %s2466_s15 = smul.u32 40, %s3532_s28 }
  0x13   : > { %s2586_s11 = scalar_lea.vmem %s3494_s0, %s2465_s20  ;;  %2370 = vmatprep.subr.bf16.mxu1 %v2369_v14  ;;  %v2378_v29 = vpack.c.bf16 %v1119_v24, %v1118_v23  ;;  %v1120_v31 = vld [vmem:[%s3497_s3 + $0x10] sm:$0xff]  ;;  %v1121_v32 = vld [vmem:[%s3497_s3 + $0x18] sm:$0xff]  ;;  %v2337_v33 = vpack.c.bf16 %v443_v27, %v442_v26  ;;  %v444_v34 = vld [vmem:[%s3496_s2 + $0x60] sm:$0xff]  ;;  %s2875_s21 = scalar_lea.vmem %s3495_s1, %s2465_s20 }
  0x14   : > { %2326 = vmatpush1.bf16.msra.mxu0 %v2325_v6  ;;  %v338_v21 = vld [vmem:[%s2586_s11 + $0x10] sm:$0xff]  ;;  %v337_v22 = vld [vmem:[%s2586_s11 + $0x8] sm:$0xff]  ;;  %2372 = vmatpush3.bf16.msra.mxu1 %v2369_v14  ;;  %v344_v30 = vld [vmem:[%s2586_s11 + $0x40] sm:$0xff]  ;;  %v2381_v37 = vpack.c.bf16 %v1121_v32, %v1120_v31  ;;  %s335_s18 = scalar_lea.vmem %s3502_s8, %s2466_s15 }
  0x15   : > { %2327 = vmatprep.subr.bf16.mxu0 %v2487_v3  ;;  %2217 = vmatprep.mubr.msk.f32.mxu1 %vm475_vm0, %v338_v21  ;;  %v341_v28 = vld [vmem:[%s2586_s11 + $0x28] sm:$0xff]  ;;  %v347_v36 = vld [vmem:[%s2586_s11 + $0x58] sm:$0xff]  ;;  %v350_v38 = vld [vmem:[%s2586_s11 + $0x70] sm:$0xff] }
  0x16   : > { %2374 = vmatprep.subr.bf16.mxu1 %v2373_v20  ;;  %636 = vmatprep.mubr.f32.mxu0 %v337_v22  ;;  %v445_v35 = vld [vmem:[%s3496_s2 + $0x68] sm:$0xff]  ;;  %v1122_v39 = vld [vmem:[%s3497_s3 + $0x20] sm:$0xff]  ;;  %v446_v42 = vld [vmem:[%s3496_s2 + $0x70] sm:$0xff] }
  0x17   : > { %v1123_v40 = vld [vmem:[%s3497_s3 + $0x28] sm:$0xff]  ;;  %v2340_v41 = vpack.c.bf16 %v445_v35, %v444_v34  ;;  %v447_v43 = vld [vmem:[%s3496_s2 + $0x78] sm:$0xff]  ;;  %v356_v46 = vld [vmem:[%s2586_s11 + $0xa0] sm:$0xff] }
  0x18   : > { %2329 = vmatpush1.bf16.msra.mxu0 %v2328_v9  ;;  %2376 = vmatpush3.bf16.msra.mxu1 %v2373_v20  ;;  %v353_v44 = vld [vmem:[%s2586_s11 + $0x88] sm:$0xff]  ;;  %v2384_v45 = vpack.c.bf16 %v1123_v40, %v1122_v39  ;;  %v1124_v47 = vld [vmem:[%s3497_s3 + $0x30] sm:$0xff]  ;;  %v1125_v48 = vld [vmem:[%s3497_s3 + $0x38] sm:$0xff]  ;;  %v2343_v49 = vpack.c.bf16 %v447_v43, %v446_v42 }
  0x19   : > { %2330 = vmatprep.subr.bf16.mxu0 %v2487_v3  ;;  %2377 = vmatprep.subr.bf16.mxu1 %v2487_v3  ;;  %v448_v50 = vld [vmem:[%s3496_s2 + $0x80] sm:$0xff]  ;;  %v449_v51 = vld [vmem:[%s3496_s2 + $0x88] sm:$0xff]  ;;  %v359_v52 = vld [vmem:[%s2586_s11 + $0xb8] sm:$0xff]  ;;  %v2387_v53 = vpack.c.bf16 %v1125_v48, %v1124_v47 }
  0x1a   : > { %v362_v54 = vld [vmem:[%s2586_s11 + $0xd0] sm:$0xff]  ;;  %v1126_v55 = vld [vmem:[%s3497_s3 + $0x40] sm:$0xff]  ;;  %v1127_v56 = vld [vmem:[%s3497_s3 + $0x48] sm:$0xff]  ;;  %v2346_v57 = vpack.c.bf16 %v449_v51, %v448_v50 }
  0x1b   : > { %2218 = vmatmul.mubr.msk.f32.vlgmr.msra.gmra.mrb[0].mxu1 %vm475_vm0, %v341_v28  ;;  %v450_v58 = vld [vmem:[%s3496_s2 + $0x90] sm:$0xff]  ;;  %v451_v59 = vld [vmem:[%s3496_s2 + $0x98] sm:$0xff]  ;;  %v365_v60 = vld [vmem:[%s2586_s11 + $0xe8] sm:$0xff]  ;;  %v2390_v61 = vpack.c.bf16 %v1127_v56, %v1126_v55 }
  0x1c   : > { %2332 = vmatpush1.bf16.msra.mxu0 %v2331_v16  ;;  %2379 = vmatpush1.bf16.msra.mxu1 %v2378_v29  ;;  %v368_v62 = vld [vmem:[%s2586_s11 + $0x100] sm:$0xff]  ;;  %v1128_v63 = vld [vmem:[%s3497_s3 + $0x50] sm:$0xff]  ;;  %v1129_v0 = vld [vmem:[%s3497_s3 + $0x58] sm:$0xff]  ;;  %v2349_v1 = vpack.c.bf16 %v451_v59, %v450_v58 }
  0x1d   : > { %2333 = vmatprep.subr.bf16.mxu0 %v2487_v3  ;;  %2220 = vmatprep.mubr.msk.f32.mxu1 %vm475_vm0, %v344_v30  ;;  %v452_v2 = vld [vmem:[%s3496_s2 + $0xa0] sm:$0xff]  ;;  %v453_v4 = vld [vmem:[%s3496_s2 + $0xa8] sm:$0xff]  ;;  %v371_v5 = vld [vmem:[%s2586_s11 + $0x118] sm:$0xff]  ;;  %v2393_v6 = vpack.c.bf16 %v1129_v0, %v1128_v63 }
  0x1e   : > { %2380 = vmatprep.subr.bf16.mxu1 %v2487_v3  ;;  %v374_v7 = vld [vmem:[%s2586_s11 + $0x130] sm:$0xff]  ;;  %v1130_v8 = vld [vmem:[%s3497_s3 + $0x60] sm:$0xff]  ;;  %v1131_v9 = vld [vmem:[%s3497_s3 + $0x68] sm:$0xff]  ;;  %v2352_v10 = vpack.c.bf16 %v453_v4, %v452_v2 }
  0x1f   : > { %2221 = vmatmul.mubr.msk.f32.gmra.mrb[2].mxu1 %vm475_vm0, %v347_v36  ;;  %v454_v11 = vld [vmem:[%s3496_s2 + $0xb0] sm:$0xff]  ;;  %v455_v12 = vld [vmem:[%s3496_s2 + $0xb8] sm:$0xff]  ;;  %v377_v13 = vld [vmem:[%s2586_s11 + $0x148] sm:$0xff]  ;;  %v2396_v14 = vpack.c.bf16 %v1131_v9, %v1130_v8 }
  0x20   : > { %2335 = vmatpush1.bf16.msra.mxu0 %v2334_v25  ;;  %2382 = vmatpush1.bf16.msra.mxu1 %v2381_v37  ;;  %v380_v15 = vld [vmem:[%s2586_s11 + $0x160] sm:$0xff]  ;;  %v1132_v16 = vld [vmem:[%s3497_s3 + $0x70] sm:$0xff]  ;;  %v1133_v17 = vld [vmem:[%s3497_s3 + $0x78] sm:$0xff]  ;;  %v2355_v18 = vpack.c.bf16 %v455_v12, %v454_v11 }
  0x21   : > { %2336 = vmatprep.subr.bf16.mxu0 %v2487_v3  ;;  %2223 = vmatprep.mubr.msk.f32.mxu1 %vm475_vm0, %v350_v38  ;;  %v456_v19 = vld [vmem:[%s3496_s2 + $0xc0] sm:$0xff]  ;;  %v457_v20 = vld [vmem:[%s3496_s2 + $0xc8] sm:$0xff]  ;;  %v383_v21 = vld [vmem:[%s2586_s11 + $0x178] sm:$0xff]  ;;  %v2399_v22 = vpack.c.bf16 %v1133_v17, %v1132_v16 }
  0x22   : > { %2383 = vmatprep.subr.bf16.mxu1 %v2487_v3  ;;  %v386_v23 = vld [vmem:[%s2586_s11 + $0x190] sm:$0xff]  ;;  %v1134_v24 = vld [vmem:[%s3497_s3 + $0x80] sm:$0xff]  ;;  %v1135_v25 = vld [vmem:[%s3497_s3 + $0x88] sm:$0xff]  ;;  %v2358_v26 = vpack.c.bf16 %v457_v20, %v456_v19 }
  0x23   : > { %2224 = vmatmul.mubr.msk.f32.gmra.mrb[4].mxu1 %vm475_vm0, %v353_v44  ;;  %v458_v27 = vld [vmem:[%s3496_s2 + $0xd0] sm:$0xff]  ;;  %v459_v28 = vld [vmem:[%s3496_s2 + $0xd8] sm:$0xff]  ;;  %v389_v29 = vld [vmem:[%s2586_s11 + $0x1a8] sm:$0xff]  ;;  %v2402_v30 = vpack.c.bf16 %v1135_v25, %v1134_v24 }
  0x24   : > { %2338 = vmatpush1.bf16.msra.mxu0 %v2337_v33  ;;  %2385 = vmatpush1.bf16.msra.mxu1 %v2384_v45  ;;  %v392_v31 = vld [vmem:[%s2586_s11 + $0x1c0] sm:$0xff]  ;;  %v1136_v32 = vld [vmem:[%s3497_s3 + $0x90] sm:$0xff]  ;;  %v1137_v33 = vld [vmem:[%s3497_s3 + $0x98] sm:$0xff]  ;;  %v2361_v34 = vpack.c.bf16 %v459_v28, %v458_v27 }
  0x25   : > { %2339 = vmatprep.subr.bf16.mxu0 %v2487_v3  ;;  %2226 = vmatprep.mubr.msk.f32.mxu1 %vm475_vm0, %v356_v46  ;;  %v460_v35 = vld [vmem:[%s3496_s2 + $0xe0] sm:$0xff]  ;;  %v461_v36 = vld [vmem:[%s3496_s2 + $0xe8] sm:$0xff]  ;;  %v395_v37 = vld [vmem:[%s2586_s11 + $0x1d8] sm:$0xff]  ;;  %v2405_v38 = vpack.c.bf16 %v1137_v33, %v1136_v32 }
  0x26   : > { %2386 = vmatprep.subr.bf16.mxu1 %v2487_v3  ;;  %v398_v39 = vld [vmem:[%s2586_s11 + $0x1f0] sm:$0xff]  ;;  %v1138_v40 = vld [vmem:[%s3497_s3 + $0xa0] sm:$0xff]  ;;  %v2364_v42 = vpack.c.bf16 %v461_v36, %v460_v35  ;;  %v463_v44 = vld [vmem:[%s3496_s2 + $0xf8] sm:$0xff] }
  0x27   : > { %2227 = vmatmul.mubr.msk.f32.gmra.mrb[6].mxu1 %vm475_vm0, %v359_v52  ;;  %v462_v43 = vld [vmem:[%s3496_s2 + $0xf0] sm:$0xff]  ;;  %v401_v45 = vld [vmem:[%s2586_s11 + $0x208] sm:$0xff]  ;;  %v1150_v47 = vld [vmem:[%s3497_s3 + $0x100] sm:$0xff] }
  0x28   : > { %2341 = vmatpush1.bf16.msra.mxu0 %v2340_v41  ;;  %2388 = vmatpush1.bf16.msra.mxu1 %v2387_v53  ;;  %v1139_v41 = vld [vmem:[%s3497_s3 + $0xa8] sm:$0xff]  ;;  %v1140_v50 = vld [vmem:[%s3497_s3 + $0xb0] sm:$0xff]  ;;  %v1141_v51 = vld [vmem:[%s3497_s3 + $0xb8] sm:$0xff]  ;;  %v2367_v52 = vpack.c.bf16 %v463_v44, %v462_v43 }
  0x29   : > { %2342 = vmatprep.subr.bf16.mxu0 %v2487_v3  ;;  %2229 = vmatprep.mubr.msk.f32.mxu1 %vm475_vm0, %v362_v54  ;;  %v2408_v46 = vpack.c.bf16 %v1139_v41, %v1138_v40  ;;  %v1151_v48 = vld [vmem:[%s3497_s3 + $0x108] sm:$0xff]  ;;  %v407_v54 = vld [vmem:[%s2586_s11 + $0x238] sm:$0xff]  ;;  %v2411_v55 = vpack.c.bf16 %v1141_v51, %v1140_v50  ;;  %v410_v56 = vld [vmem:[%s2586_s11 + $0x250] sm:$0xff] }
  0x2a   : > { %2389 = vmatprep.subr.bf16.mxu1 %v2487_v3  ;;  %v2425_v53 = vpack.c.bf16 %v1151_v48, %v1150_v47  ;;  %v1143_v58 = vld [vmem:[%s3497_s3 + $0xc8] sm:$0xff]  ;;  %v336_v59 = vld [vmem:[%s2586_s11] sm:$0xff]  ;;  %v1144_v0 = vld [vmem:[%s3497_s3 + $0xd0] sm:$0xff] }
  0x2b   : > { %2230 = vmatmul.mubr.msk.f32.gmra.mrb[8].mxu1 %vm475_vm0, %v365_v60  ;;  %v340_v60 = vld [vmem:[%s2586_s11 + $0x20] sm:$0xff]  ;;  %v1152_v2 = vld [vmem:[%s3497_s3 + $0x110] sm:$0xff]  ;;  %v1153_v4 = vld [vmem:[%s3497_s3 + $0x118] sm:$0xff] }
  0x2c   : > { %2344 = vmatpush1.bf16.msra.mxu0 %v2343_v49  ;;  %2391 = vmatpush1.bf16.msra.mxu1 %v2390_v61  ;;  %v404_v49 = vld [vmem:[%s2586_s11 + $0x220] sm:$0xff]  ;;  %v413_v61 = vld [vmem:[%s2586_s11 + $0x268] sm:$0xff]  ;;  %v419_v8 = vld [vmem:[%s2586_s11 + $0x298] sm:$0xff] }
  0x2d   : > { %2345 = vmatprep.subr.bf16.mxu0 %v2487_v3  ;;  %2232 = vmatprep.mubr.msk.f32.mxu1 %vm475_vm0, %v368_v62  ;;  %v416_v63 = vld [vmem:[%s2586_s11 + $0x280] sm:$0xff]  ;;  %v1147_v12 = vld [vmem:[%s3497_s3 + $0xe8] sm:$0xff]  ;;  %v1149_v19 = vld [vmem:[%s3497_s3 + $0xf8] sm:$0xff] }
  0x2e   : > { %2392 = vmatprep.subr.bf16.mxu1 %v2487_v3  ;;  %v1146_v11 = vld [vmem:[%s3497_s3 + $0xe0] sm:$0xff]  ;;  %v345_v20 = vld [vmem:[%s2586_s11 + $0x48] sm:$0xff]  ;;  %v354_v32 = vld [vmem:[%s2586_s11 + $0x90] sm:$0xff] }
  0x2f   : > { %2233 = vmatmul.mubr.msk.f32.gmra.mrb[10].mxu1 %vm475_vm0, %v371_v5  ;;  %v339_v5 = vld [vmem:[%s2586_s11 + $0x18] sm:$0xff]  ;;  %v2420_v16 = vpack.c.bf16 %v1147_v12, %v1146_v11  ;;  %v428_v17 = vld [vmem:[%s2586_s11 + $0x2e0] sm:$0xff]  ;;  %v1023_v24 = vld [vmem:[%s2875_s21 + $0x8] sm:$0xff] }
  0x30   : > { %2347 = vmatpush1.bf16.msra.mxu0 %v2346_v57  ;;  %2394 = vmatpush1.bf16.msra.mxu1 %v2393_v6  ;;  %v1142_v57 = vld [vmem:[%s3497_s3 + $0xc0] sm:$0xff]  ;;  %v2429_v6 = vpack.c.bf16 %v1153_v4, %v1152_v2  ;;  %v358_v33 = vld [vmem:[%s2586_s11 + $0xb0] sm:$0xff]  ;;  %v357_v36 = vld [vmem:[%s2586_s11 + $0xa8] sm:$0xff] }
  0x31   : > { %2348 = vmatprep.subr.bf16.mxu0 %v2487_v3  ;;  %2235 = vmatprep.mubr.msk.f32.mxu1 %vm475_vm0, %v374_v7  ;;  %v2414_v62 = vpack.c.bf16 %v1143_v58, %v1142_v57  ;;  %v343_v7 = vld [vmem:[%s2586_s11 + $0x38] sm:$0xff]  ;;  %v348_v25 = vld [vmem:[%s2586_s11 + $0x60] sm:$0xff]  ;;  %v1032_v35 = vld [vmem:[%s2875_s21 + $0x50] sm:$0xff] }
  0x32   : > { %2395 = vmatprep.subr.bf16.mxu1 %v2487_v3  ;;  %v1022_v27 = vld [vmem:[%s2875_s21] sm:$0xff]  ;;  %v363_v44 = vld [vmem:[%s2586_s11 + $0xd8] sm:$0xff]  ;;  %v366_v48 = vld [vmem:[%s2586_s11 + $0xf0] sm:$0xff] }
  0x33   : > { %2236 = vmatmul.mubr.msk.f32.gmra.mrb[12].mxu1 %vm475_vm0, %v377_v13  ;;  %v342_v13 = vld [vmem:[%s2586_s11 + $0x30] sm:$0xff]  ;;  %v1026_v28 = vld [vmem:[%s2875_s21 + $0x20] sm:$0xff]  ;;  %v1041_v47 = vld [vmem:[%s2875_s21 + $0x98] sm:$0xff] }
  0x34   : > { %2350 = vmatpush1.bf16.msra.mxu0 %v2349_v1  ;;  %2397 = vmatpush1.bf16.msra.mxu1 %v2396_v14  ;;  %v1145_v1 = vld [vmem:[%s3497_s3 + $0xd8] sm:$0xff]  ;;  %v346_v14 = vld [vmem:[%s2586_s11 + $0x50] sm:$0xff]  ;;  %v360_v40 = vld [vmem:[%s2586_s11 + $0xc0] sm:$0xff] }
  0x35   : > { %2351 = vmatprep.subr.bf16.mxu0 %v2487_v3  ;;  %2238 = vmatprep.mubr.msk.f32.mxu1 %vm475_vm0, %v380_v15  ;;  %v2417_v9 = vpack.c.bf16 %v1145_v1, %v1144_v0  ;;  %v425_v15 = vld [vmem:[%s2586_s11 + $0x2c8] sm:$0xff]  ;;  %v364_v41 = vld [vmem:[%s2586_s11 + $0xe0] sm:$0xff]  ;;  %v1040_v50 = vld [vmem:[%s2875_s21 + $0x90] sm:$0xff] }
  0x36   : > { %2398 = vmatprep.subr.bf16.mxu1 %v2487_v3  ;;  %v1038_v43 = vld [vmem:[%s2875_s21 + $0x80] sm:$0xff]  ;;  %v1044_v51 = vld [vmem:[%s2875_s21 + $0xb0] sm:$0xff] }
  0x37   : > { %2239 = vmatmul.mubr.msk.f32.gmra.mrb[14].mxu1 %vm475_vm0, %v383_v21  ;;  %v349_v21 = vld [vmem:[%s2586_s11 + $0x68] sm:$0xff]  ;;  %v376_v57 = vld [vmem:[%s2586_s11 + $0x140] sm:$0xff]  ;;  %v378_v0 = vld [vmem:[%s2586_s11 + $0x150] sm:$0xff] }
  0x38   : > { %2353 = vmatpush1.bf16.msra.mxu0 %v2352_v10  ;;  %2400 = vmatpush1.bf16.msra.mxu1 %v2399_v22  ;;  %v422_v10 = vld [vmem:[%s2586_s11 + $0x2b0] sm:$0xff]  ;;  %v431_v22 = vld [vmem:[%s2586_s11 + $0x2f8] sm:$0xff]  ;;  %v1046_v58 = vld [vmem:[%s2875_s21 + $0xc0] sm:$0xff] }
  0x39   : > { %2354 = vmatprep.subr.bf16.mxu0 %v2487_v3  ;;  %2241 = vmatprep.mubr.msk.f32.mxu1 %vm475_vm0, %v386_v23  ;;  %v382_v1 = vld [vmem:[%s2586_s11 + $0x170] sm:$0xff]  ;;  %v1058_v11 = vld [vmem:[%s2875_s21 + $0x120] sm:$0xff] }
  0x3a   : > { %2401 = vmatprep.subr.bf16.mxu1 %v2487_v3  ;;  %v1052_v2 = vld [vmem:[%s2875_s21 + $0xf0] sm:$0xff]  ;;  %v1062_v12 = vld [vmem:[%s2875_s21 + $0x140] sm:$0xff] }
  0x3b   : > { %2242 = vmatmul.mubr.msk.f32.gmra.mrb[16].mxu1 %vm475_vm0, %v389_v29  ;;  %v351_v29 = vld [vmem:[%s2586_s11 + $0x78] sm:$0xff]  ;;  %v1056_v4 = vld [vmem:[%s2875_s21 + $0x110] sm:$0xff] }
  0x3c   : > { %2356 = vmatpush1.bf16.msra.mxu0 %v2355_v18  ;;  %2403 = vmatpush1.bf16.msra.mxu1 %v2402_v30  ;;  %v1148_v18 = vld [vmem:[%s3497_s3 + $0xf0] sm:$0xff]  ;;  %v1025_v30 = vld [vmem:[%s2875_s21 + $0x18] sm:$0xff] }
  0x3d   : > { %2357 = vmatprep.subr.bf16.mxu0 %v2487_v3  ;;  %2244 = vmatprep.mubr.msk.f32.mxu1 %vm475_vm0, %v392_v31  ;;  %v2423_v23 = vpack.c.bf16 %v1149_v19, %v1148_v18  ;;  %v1029_v31 = vld [vmem:[%s2875_s21 + $0x38] sm:$0xff]  ;;  %v394_v18 = vld [vmem:[%s2586_s11 + $0x1d0] sm:$0xff] }
  0x3e   : > { %2404 = vmatprep.subr.bf16.mxu1 %v2487_v3  ;;  %v1064_v19 = vld [vmem:[%s2875_s21 + $0x150] sm:$0xff] }
  0x3f   : > { %2245 = vmatmul.mubr.msk.f32.gmra.mrb[18].mxu1 %vm475_vm0, %v395_v37  ;;  %v361_v37 = vld [vmem:[%s2586_s11 + $0xc8] sm:$0xff] }
  0x40   : > { %2359 = vmatpush1.bf16.msra.mxu0 %v2358_v26  ;;  %2406 = vmatpush1.bf16.msra.mxu1 %v2405_v38  ;;  %v352_v26 = vld [vmem:[%s2586_s11 + $0x80] sm:$0xff]  ;;  %v1031_v38 = vld [vmem:[%s2875_s21 + $0x48] sm:$0xff] }
  0x41   : > { %2360 = vmatprep.subr.bf16.mxu0 %v2487_v3  ;;  %2247 = vmatprep.mubr.msk.f32.mxu1 %vm475_vm0, %v398_v39  ;;  %v1035_v39 = vld [vmem:[%s2875_s21 + $0x68] sm:$0xff] }
  0x42   : > { %2407 = vmatprep.subr.bf16.mxu1 %v2487_v3 }
  0x43   : > { %2248 = vmatmul.mubr.msk.f32.gmra.mrb[20].mxu1 %vm475_vm0, %v401_v45  ;;  %v367_v45 = vld [vmem:[%s2586_s11 + $0xf8] sm:$0xff] }
  0x44   : > { %2362 = vmatpush1.bf16.msra.mxu0 %v2361_v34  ;;  %2409 = vmatpush1.bf16.msra.mxu1 %v2408_v46  ;;  %v1028_v34 = vld [vmem:[%s2875_s21 + $0x30] sm:$0xff]  ;;  %v1037_v46 = vld [vmem:[%s2875_s21 + $0x78] sm:$0xff] }
  0x45   : > { %2363 = vmatprep.subr.bf16.mxu0 %v2487_v3  ;;  %2250 = vmatprep.mubr.msk.f32.mxu1 %vm475_vm0, %v404_v49  ;;  %v370_v49 = vld [vmem:[%s2586_s11 + $0x110] sm:$0xff] }
  0x46   : > { %2410 = vmatprep.subr.bf16.mxu1 %v2487_v3 }
  0x47   : > { %2251 = vmatmul.mubr.msk.f32.gmra.mrb[22].mxu1 %vm475_vm0, %v407_v54  ;;  %v1043_v54 = vld [vmem:[%s2875_s21 + $0xa8] sm:$0xff] }
  0x48   : > { %2365 = vmatpush1.bf16.msra.mxu0 %v2364_v42  ;;  %2412 = vmatpush1.bf16.msra.mxu1 %v2411_v55  ;;  %v1034_v42 = vld [vmem:[%s2875_s21 + $0x60] sm:$0xff]  ;;  %v1047_v55 = vld [vmem:[%s2875_s21 + $0xc8] sm:$0xff] }
  0x49   : > { %2366 = vmatprep.subr.bf16.mxu0 %v2487_v3  ;;  %2253 = vmatprep.mubr.msk.f32.mxu1 %vm475_vm0, %v410_v56  ;;  %v372_v56 = vld [vmem:[%s2586_s11 + $0x120] sm:$0xff] }
  0x4a   : > { %2413 = vmatprep.subr.bf16.mxu1 %v2487_v3 }
  0x4b   : > { %2254 = vmatmul.mubr.msk.f32.gmra.mrb[24].mxu1 %vm475_vm0, %v413_v61  ;;  %v379_v61 = vld [vmem:[%s2586_s11 + $0x158] sm:$0xff] }
  0x4c   : > { %2368 = vmatpush1.bf16.msra.mxu0 %v2367_v52  ;;  %2415 = vmatpush1.bf16.msra.mxu1 %v2414_v62  ;;  %v369_v52 = vld [vmem:[%s2586_s11 + $0x108] sm:$0xff]  ;;  %v1049_v62 = vld [vmem:[%s2875_s21 + $0xd8] sm:$0xff] }
  0x4d   : > { %2426 = vmatprep.subr.bf16.mxu0 %v2425_v53  ;;  %2256 = vmatprep.mubr.msk.f32.mxu1 %vm475_vm0, %v416_v63  ;;  %v1053_v63 = vld [vmem:[%s2875_s21 + $0xf8] sm:$0xff] }
  0x4e   : > { %2416 = vmatprep.subr.bf16.mxu1 %v2487_v3 }
  0x4f   : > { %637 = vmatmul.mubr.f32.vlgmr.msra.gmra.mrb[0].mxu0 %v336_v59  ;;  %2257 = vmatmul.mubr.msk.f32.gmra.mrb[26].mxu1 %vm475_vm0, %v419_v8  ;;  %v1050_v59 = vld [vmem:[%s2875_s21 + $0xe0] sm:$0xff]  ;;  %v1059_v8 = vld [vmem:[%s2875_s21 + $0x128] sm:$0xff] }
  0x50   : > { %641 = vmatprep.mubr.f32.mxu0 %v340_v60  ;;  %2428 = vmatpush3.bf16.msra.mxu0 %v2425_v53  ;;  %v373_v53 = vld [vmem:[%s2586_s11 + $0x128] sm:$0xff]  ;;  %v375_v60 = vld [vmem:[%s2586_s11 + $0x138] sm:$0xff] }
  0x51   : > { %2430 = vmatprep.subr.bf16.mxu0 %v2429_v6  ;;  %2418 = vmatpush1.bf16.msra.mxu1 %v2417_v9  ;;  %v384_v9 = vld [vmem:[%s2586_s11 + $0x180] sm:$0xff] }
  0x52   : > { %2259 = vmatprep.mubr.msk.f32.mxu1 %vm475_vm0, %v422_v10  ;;  %2419 = vmatprep.subr.bf16.mxu1 %v2487_v3  ;;  %v388_v10 = vld [vmem:[%s2586_s11 + $0x1a0] sm:$0xff] }
  0x53   : > { %642 = vmatmul.mubr.f32.gmra.mrb[2].mxu0 %v339_v5  ;;  %2260 = vmatmul.mubr.msk.f32.gmra.mrb[28].mxu1 %vm475_vm0, %v425_v15  ;;  %v381_v5 = vld [vmem:[%s2586_s11 + $0x168] sm:$0xff]  ;;  %v1061_v15 = vld [vmem:[%s2875_s21 + $0x138] sm:$0xff] }
  0x54   : > { %646 = vmatprep.mubr.f32.mxu0 %v343_v7  ;;  %2432 = vmatpush3.bf16.msra.mxu0 %v2429_v6  ;;  %v385_v6 = vld [vmem:[%s2586_s11 + $0x188] sm:$0xff] }
  0x55   : > { %2421 = vmatpush1.bf16.msra.mxu1 %v2420_v16  ;;  %2262 = vmatprep.mubr.msk.f32.mxu1 %vm475_vm0, %v428_v17  ;;  %v1055_v7 = vld [vmem:[%s2875_s21 + $0x108] sm:$0xff]  ;;  %v1065_v16 = vld [vmem:[%s2875_s21 + $0x158] sm:$0xff]  ;;  %v390_v17 = vld [vmem:[%s2586_s11 + $0x1b0] sm:$0xff] }
  0x56   : > { %2422 = vmatprep.subr.bf16.mxu1 %v2487_v3  ;;  %v355_v3 = vld [vmem:[%s2586_s11 + $0x98] sm:$0xff] }
  0x57   : > { %647 = vmatmul.mubr.f32.gmra.mrb[4].mxu0 %v342_v13  ;;  %2263 = vmatmul.mubr.msk.f32.gmra.mrb[30].mxu1 %vm475_vm0, %v431_v22  ;;  %v387_v13 = vld [vmem:[%s2586_s11 + $0x198] sm:$0xff]  ;;  %v397_v22 = vld [vmem:[%s2586_s11 + $0x1e8] sm:$0xff] }
  0x58   : > { %651 = vmatprep.mubr.f32.mxu0 %v346_v14  ;;  %1321 = vmatprep.mubr.f32.mxu1 %v1023_v24  ;;  %v391_v14 = vld [vmem:[%s2586_s11 + $0x1b8] sm:$0xff]  ;;  %v1071_v24 = vld [vmem:[%s2875_s21 + $0x188] sm:$0xff] }
  0x59   : > { %2424 = vmatpush1.bf16.msra.mxu1 %v2423_v23  ;;  %v1067_v23 = vld [vmem:[%s2875_s21 + $0x168] sm:$0xff] }
  0x5b   : > { %652 = vmatmul.mubr.f32.gmra.mrb[6].mxu0 %v345_v20  ;;  %v1068_v20 = vld [vmem:[%s2875_s21 + $0x170] sm:$0xff] }
  0x5c   : > { %656 = vmatprep.mubr.f32.mxu0 %v349_v21  ;;  %1322 = vmatmul.mubr.f32.vlgmr.msra.gmra.mrb[32].mxu1 %v1022_v27  ;;  %v393_v21 = vld [vmem:[%s2586_s11 + $0x1c8] sm:$0xff]  ;;  %v1070_v27 = vld [vmem:[%s2875_s21 + $0x180] sm:$0xff] }
  0x5d   : > { %1326 = vmatprep.mubr.f32.mxu1 %v1026_v28  ;;  %v1074_v28 = vld [vmem:[%s2875_s21 + $0x1a0] sm:$0xff] }
  0x5f   : > { %657 = vmatmul.mubr.f32.gmra.mrb[8].mxu0 %v348_v25  ;;  %v396_v25 = vld [vmem:[%s2586_s11 + $0x1e0] sm:$0xff] }
  0x60   : > { %661 = vmatprep.mubr.f32.mxu0 %v352_v26  ;;  %1327 = vmatmul.mubr.f32.gmra.mrb[34].mxu1 %v1025_v30  ;;  %v400_v26 = vld [vmem:[%s2586_s11 + $0x200] sm:$0xff]  ;;  %v1073_v30 = vld [vmem:[%s2875_s21 + $0x198] sm:$0xff] }
  0x61   : > { %1331 = vmatprep.mubr.f32.mxu1 %v1029_v31  ;;  %v1077_v31 = vld [vmem:[%s2875_s21 + $0x1b8] sm:$0xff] }
  0x63   : > { %662 = vmatmul.mubr.f32.gmra.mrb[10].mxu0 %v351_v29  ;;  %v399_v29 = vld [vmem:[%s2586_s11 + $0x1f8] sm:$0xff] }
  0x64   : > { %666 = vmatprep.mubr.f32.mxu0 %v355_v3  ;;  %1332 = vmatmul.mubr.f32.gmra.mrb[36].mxu1 %v1028_v34  ;;  %v403_v3 = vld [vmem:[%s2586_s11 + $0x218] sm:$0xff]  ;;  %v1076_v34 = vld [vmem:[%s2875_s21 + $0x1b0] sm:$0xff] }
  0x65   : > { %1336 = vmatprep.mubr.f32.mxu1 %v1032_v35  ;;  %v1080_v35 = vld [vmem:[%s2875_s21 + $0x1d0] sm:$0xff] }
  0x67   : > { %667 = vmatmul.mubr.f32.gmra.mrb[12].mxu0 %v354_v32  ;;  %v402_v32 = vld [vmem:[%s2586_s11 + $0x210] sm:$0xff] }
  0x68   : > { %671 = vmatprep.mubr.f32.mxu0 %v358_v33  ;;  %1337 = vmatmul.mubr.f32.gmra.mrb[38].mxu1 %v1031_v38  ;;  %v406_v33 = vld [vmem:[%s2586_s11 + $0x230] sm:$0xff]  ;;  %v1079_v38 = vld [vmem:[%s2875_s21 + $0x1c8] sm:$0xff] }
  0x69   : > { %1341 = vmatprep.mubr.f32.mxu1 %v1035_v39  ;;  %v1083_v39 = vld [vmem:[%s2875_s21 + $0x1e8] sm:$0xff] }
  0x6b   : > { %672 = vmatmul.mubr.f32.gmra.mrb[14].mxu0 %v357_v36  ;;  %v405_v36 = vld [vmem:[%s2586_s11 + $0x228] sm:$0xff] }
  0x6c   : > { %676 = vmatprep.mubr.f32.mxu0 %v361_v37  ;;  %1342 = vmatmul.mubr.f32.gmra.mrb[40].mxu1 %v1034_v42  ;;  %v409_v37 = vld [vmem:[%s2586_s11 + $0x248] sm:$0xff]  ;;  %v1082_v42 = vld [vmem:[%s2875_s21 + $0x1e0] sm:$0xff] }
  0x6d   : > { %1346 = vmatprep.mubr.f32.mxu1 %v1038_v43  ;;  %v1086_v43 = vld [vmem:[%s2875_s21 + $0x200] sm:$0xff] }
  0x6f   : > { %677 = vmatmul.mubr.f32.gmra.mrb[16].mxu0 %v360_v40  ;;  %v408_v40 = vld [vmem:[%s2586_s11 + $0x240] sm:$0xff] }
  0x70   : > { %681 = vmatprep.mubr.f32.mxu0 %v364_v41  ;;  %1347 = vmatmul.mubr.f32.gmra.mrb[42].mxu1 %v1037_v46  ;;  %v412_v41 = vld [vmem:[%s2586_s11 + $0x260] sm:$0xff]  ;;  %v1085_v46 = vld [vmem:[%s2875_s21 + $0x1f8] sm:$0xff] }
  0x71   : > { %1351 = vmatprep.mubr.f32.mxu1 %v1041_v47  ;;  %v1089_v47 = vld [vmem:[%s2875_s21 + $0x218] sm:$0xff] }
  0x73   : > { %682 = vmatmul.mubr.f32.gmra.mrb[18].mxu0 %v363_v44  ;;  %v411_v44 = vld [vmem:[%s2586_s11 + $0x258] sm:$0xff] }
  0x74   : > { %686 = vmatprep.mubr.f32.mxu0 %v367_v45  ;;  %1352 = vmatmul.mubr.f32.gmra.mrb[44].mxu1 %v1040_v50  ;;  %v415_v45 = vld [vmem:[%s2586_s11 + $0x278] sm:$0xff]  ;;  %v1088_v50 = vld [vmem:[%s2875_s21 + $0x210] sm:$0xff] }
  0x75   : > { %1356 = vmatprep.mubr.f32.mxu1 %v1044_v51  ;;  %v1092_v51 = vld [vmem:[%s2875_s21 + $0x230] sm:$0xff] }
  0x77   : > { %687 = vmatmul.mubr.f32.gmra.mrb[20].mxu0 %v366_v48  ;;  %v414_v48 = vld [vmem:[%s2586_s11 + $0x270] sm:$0xff] }
  0x78   : > { %691 = vmatprep.mubr.f32.mxu0 %v370_v49  ;;  %1357 = vmatmul.mubr.f32.gmra.mrb[46].mxu1 %v1043_v54  ;;  %v418_v49 = vld [vmem:[%s2586_s11 + $0x290] sm:$0xff]  ;;  %v1091_v54 = vld [vmem:[%s2875_s21 + $0x228] sm:$0xff] }
  0x79   : > { %1361 = vmatprep.mubr.f32.mxu1 %v1047_v55  ;;  %v1095_v55 = vld [vmem:[%s2875_s21 + $0x248] sm:$0xff] }
  0x7b   : > { %692 = vmatmul.mubr.f32.gmra.mrb[22].mxu0 %v369_v52  ;;  %v417_v52 = vld [vmem:[%s2586_s11 + $0x288] sm:$0xff] }
  0x7c   : > { %696 = vmatprep.mubr.f32.mxu0 %v373_v53  ;;  %1362 = vmatmul.mubr.f32.gmra.mrb[48].mxu1 %v1046_v58  ;;  %v421_v53 = vld [vmem:[%s2586_s11 + $0x2a8] sm:$0xff]  ;;  %v1094_v58 = vld [vmem:[%s2875_s21 + $0x240] sm:$0xff] }
  0x7d   : > { %1366 = vmatprep.mubr.f32.mxu1 %v1050_v59  ;;  %v1098_v59 = vld [vmem:[%s2875_s21 + $0x260] sm:$0xff] }
  0x7f   : > { %697 = vmatmul.mubr.f32.gmra.mrb[24].mxu0 %v372_v56  ;;  %v420_v56 = vld [vmem:[%s2586_s11 + $0x2a0] sm:$0xff] }
  0x80   : > { %701 = vmatprep.mubr.f32.mxu0 %v376_v57  ;;  %1367 = vmatmul.mubr.f32.gmra.mrb[50].mxu1 %v1049_v62  ;;  %v424_v57 = vld [vmem:[%s2586_s11 + $0x2c0] sm:$0xff]  ;;  %v1097_v62 = vld [vmem:[%s2875_s21 + $0x258] sm:$0xff] }
  0x81   : > { %1371 = vmatprep.mubr.f32.mxu1 %v1053_v63  ;;  %v1101_v63 = vld [vmem:[%s2875_s21 + $0x278] sm:$0xff] }
  0x83   : > { %702 = vmatmul.mubr.f32.gmra.mrb[26].mxu0 %v375_v60  ;;  %v423_v60 = vld [vmem:[%s2586_s11 + $0x2b8] sm:$0xff] }
  0x84   : > { %706 = vmatprep.mubr.f32.mxu0 %v379_v61  ;;  %1372 = vmatmul.mubr.f32.gmra.mrb[52].mxu1 %v1052_v2  ;;  %v427_v61 = vld [vmem:[%s2586_s11 + $0x2d8] sm:$0xff]  ;;  %v1100_v2 = vld [vmem:[%s2875_s21 + $0x270] sm:$0xff] }
  0x85   : > { %1376 = vmatprep.mubr.f32.mxu1 %v1056_v4  ;;  %v1104_v4 = vld [vmem:[%s2875_s21 + $0x290] sm:$0xff] }
  0x87   : > { %707 = vmatmul.mubr.f32.gmra.mrb[28].mxu0 %v378_v0  ;;  %v426_v0 = vld [vmem:[%s2586_s11 + $0x2d0] sm:$0xff] }
  0x88   : > { %711 = vmatprep.mubr.f32.mxu0 %v382_v1  ;;  %1377 = vmatmul.mubr.f32.gmra.mrb[54].mxu1 %v1055_v7  ;;  %v430_v1 = vld [vmem:[%s2586_s11 + $0x2f0] sm:$0xff]  ;;  %v1103_v7 = vld [vmem:[%s2875_s21 + $0x288] sm:$0xff] }
  0x89   : > { %1381 = vmatprep.mubr.f32.mxu1 %v1059_v8  ;;  %v1107_v8 = vld [vmem:[%s2875_s21 + $0x2a8] sm:$0xff] }
  0x8b   : > { %712 = vmatmul.mubr.f32.gmra.mrb[30].mxu0 %v381_v5  ;;  %v429_v5 = vld [vmem:[%s2586_s11 + $0x2e8] sm:$0xff] }
  0x8c   : > { %716 = vmatprep.mubr.f32.mxu0 %v385_v6  ;;  %1382 = vmatmul.mubr.f32.gmra.mrb[56].mxu1 %v1058_v11  ;;  %v1024_v6 = vld [vmem:[%s2875_s21 + $0x10] sm:$0xff]  ;;  %v1106_v11 = vld [vmem:[%s2875_s21 + $0x2a0] sm:$0xff] }
  0x8d   : > { %1386 = vmatprep.mubr.f32.mxu1 %v1062_v12  ;;  %v1110_v12 = vld [vmem:[%s2875_s21 + $0x2c0] sm:$0xff] }
  0x8f   : > { %717 = vmatmul.mubr.f32.gmra.mrb[32].mxu0 %v384_v9  ;;  %v1027_v9 = vld [vmem:[%s2875_s21 + $0x28] sm:$0xff] }
  0x90   : > { %721 = vmatprep.mubr.f32.mxu0 %v388_v10  ;;  %1387 = vmatmul.mubr.f32.gmra.mrb[58].mxu1 %v1061_v15  ;;  %v1030_v10 = vld [vmem:[%s2875_s21 + $0x40] sm:$0xff]  ;;  %v1109_v15 = vld [vmem:[%s2875_s21 + $0x2b8] sm:$0xff] }
  0x91   : > { %1391 = vmatprep.mubr.f32.mxu1 %v1065_v16  ;;  %v1113_v16 = vld [vmem:[%s2875_s21 + $0x2d8] sm:$0xff] }
  0x93   : > { %722 = vmatmul.mubr.f32.gmra.mrb[34].mxu0 %v387_v13  ;;  %v1033_v13 = vld [vmem:[%s2875_s21 + $0x58] sm:$0xff] }
  0x94   : > { %726 = vmatprep.mubr.f32.mxu0 %v391_v14  ;;  %1392 = vmatmul.mubr.f32.gmra.mrb[60].mxu1 %v1064_v19  ;;  %v1036_v14 = vld [vmem:[%s2875_s21 + $0x70] sm:$0xff] }
  0x95   : > { %1396 = vmatprep.mubr.f32.mxu1 %v1068_v20  ;;  %v1112_v19 = vld [vmem:[%s2875_s21 + $0x2d0] sm:$0xff] }
  0x96   : > { %v1116_v20 = vld [vmem:[%s2875_s21 + $0x2f0] sm:$0xff] }
  0x97   : > { %727 = vmatmul.mubr.f32.gmra.mrb[36].mxu0 %v390_v17  ;;  %v1039_v17 = vld [vmem:[%s2875_s21 + $0x88] sm:$0xff] }
  0x98   : > { %731 = vmatprep.mubr.f32.mxu0 %v394_v18  ;;  %1397 = vmatmul.mubr.f32.gmra.mrb[62].mxu1 %v1067_v23  ;;  %v1042_v18 = vld [vmem:[%s2875_s21 + $0xa0] sm:$0xff]  ;;  %v1115_v23 = vld [vmem:[%s2875_s21 + $0x2e8] sm:$0xff] }
  0x99   : > { %1401 = vmatprep.mubr.f32.mxu1 %v1071_v24  ;;  %v1051_v24 = vld [vmem:[%s2875_s21 + $0xe8] sm:$0xff] }
  0x9b   : > { %732 = vmatmul.mubr.f32.gmra.mrb[38].mxu0 %v393_v21  ;;  %v1045_v21 = vld [vmem:[%s2875_s21 + $0xb8] sm:$0xff] }
  0x9c   : > { %736 = vmatprep.mubr.f32.mxu0 %v397_v22  ;;  %1402 = vmatmul.mubr.f32.gmra.mrb[64].mxu1 %v1070_v27  ;;  %v1048_v22 = vld [vmem:[%s2875_s21 + $0xd0] sm:$0xff] }
  0x9d   : > { %1406 = vmatprep.mubr.f32.mxu1 %v1074_v28  ;;  %v1060_v27 = vld [vmem:[%s2875_s21 + $0x130] sm:$0xff]  ;;  %v1063_v28 = vld [vmem:[%s2875_s21 + $0x148] sm:$0xff] }
  0x9f   : > { %737 = vmatmul.mubr.f32.gmra.mrb[40].mxu0 %v396_v25  ;;  %v1054_v25 = vld [vmem:[%s2875_s21 + $0x100] sm:$0xff] }
  0xa0   : > { %741 = vmatprep.mubr.f32.mxu0 %v400_v26  ;;  %1407 = vmatmul.mubr.f32.gmra.mrb[66].mxu1 %v1073_v30  ;;  %v1057_v26 = vld [vmem:[%s2875_s21 + $0x118] sm:$0xff]  ;;  %v1072_v30 = vld [vmem:[%s2875_s21 + $0x190] sm:$0xff] }
  0xa1   : > { %1411 = vmatprep.mubr.f32.mxu1 %v1077_v31  ;;  %v1075_v31 = vld [vmem:[%s2875_s21 + $0x1a8] sm:$0xff] }
  0xa3   : > { %742 = vmatmul.mubr.f32.gmra.mrb[42].mxu0 %v399_v29  ;;  %v1066_v29 = vld [vmem:[%s2875_s21 + $0x160] sm:$0xff] }
  0xa4   : > { %746 = vmatprep.mubr.f32.mxu0 %v403_v3  ;;  %1412 = vmatmul.mubr.f32.gmra.mrb[68].mxu1 %v1076_v34  ;;  %v1069_v3 = vld [vmem:[%s2875_s21 + $0x178] sm:$0xff]  ;;  %v1084_v34 = vld [vmem:[%s2875_s21 + $0x1f0] sm:$0xff] }
  0xa5   : > { %1416 = vmatprep.mubr.f32.mxu1 %v1080_v35  ;;  %v1087_v35 = vld [vmem:[%s2875_s21 + $0x208] sm:$0xff] }
  0xa7   : > { %747 = vmatmul.mubr.f32.gmra.mrb[44].mxu0 %v402_v32  ;;  %v1078_v32 = vld [vmem:[%s2875_s21 + $0x1c0] sm:$0xff] }
  0xa8   : > { %751 = vmatprep.mubr.f32.mxu0 %v406_v33  ;;  %1417 = vmatmul.mubr.f32.gmra.mrb[70].mxu1 %v1079_v38  ;;  %v1081_v33 = vld [vmem:[%s2875_s21 + $0x1d8] sm:$0xff] }
  0xa9   : > { %1421 = vmatprep.mubr.f32.mxu1 %v1083_v39  ;;  %v1093_v39 = vld [vmem:[%s2875_s21 + $0x238] sm:$0xff] }
  0xab   : > { %752 = vmatmul.mubr.f32.gmra.mrb[46].mxu0 %v405_v36 }
  0xac   : > { %756 = vmatprep.mubr.f32.mxu0 %v409_v37  ;;  %1422 = vmatmul.mubr.f32.gmra.mrb[72].mxu1 %v1082_v42  ;;  %v1090_v37 = vld [vmem:[%s2875_s21 + $0x220] sm:$0xff] }
  0xad   : > { %1426 = vmatprep.mubr.f32.mxu1 %v1086_v43  ;;  %v1099_v43 = vld [vmem:[%s2875_s21 + $0x268] sm:$0xff] }
  0xaf   : > { %757 = vmatmul.mubr.f32.gmra.mrb[48].mxu0 %v408_v40 }
  0xb0   : > { %761 = vmatprep.mubr.f32.mxu0 %v412_v41  ;;  %1427 = vmatmul.mubr.f32.gmra.mrb[74].mxu1 %v1085_v46  ;;  %v1096_v41 = vld [vmem:[%s2875_s21 + $0x250] sm:$0xff] }
  0xb1   : > { %1431 = vmatprep.mubr.f32.mxu1 %v1089_v47  ;;  %v1105_v47 = vld [vmem:[%s2875_s21 + $0x298] sm:$0xff] }
  0xb3   : > { %762 = vmatmul.mubr.f32.gmra.mrb[50].mxu0 %v411_v44 }
  0xb4   : > { %766 = vmatprep.mubr.f32.mxu0 %v415_v45  ;;  %1432 = vmatmul.mubr.f32.gmra.mrb[76].mxu1 %v1088_v50  ;;  %v1102_v45 = vld [vmem:[%s2875_s21 + $0x280] sm:$0xff] }
  0xb5   : > { %1436 = vmatprep.mubr.f32.mxu1 %v1092_v51  ;;  %v1111_v51 = vld [vmem:[%s2875_s21 + $0x2c8] sm:$0xff] }
  0xb7   : > { %767 = vmatmul.mubr.f32.gmra.mrb[52].mxu0 %v414_v48 }
  0xb8   : > { %771 = vmatprep.mubr.f32.mxu0 %v418_v49  ;;  %1437 = vmatmul.mubr.f32.gmra.mrb[78].mxu1 %v1091_v54  ;;  %v1108_v49 = vld [vmem:[%s2875_s21 + $0x2b0] sm:$0xff] }
  0xb9   : > { %1441 = vmatprep.mubr.f32.mxu1 %v1095_v55  ;;  %v1117_v55 = vld [vmem:[%s2875_s21 + $0x2f8] sm:$0xff] }
  0xbb   : > { %772 = vmatmul.mubr.f32.gmra.mrb[54].mxu0 %v417_v52 }
  0xbc   : > { %776 = vmatprep.mubr.f32.mxu0 %v421_v53  ;;  %1442 = vmatmul.mubr.f32.gmra.mrb[80].mxu1 %v1094_v58  ;;  %v1114_v53 = vld [vmem:[%s2875_s21 + $0x2e0] sm:$0xff] }
  0xbd   : > { %1446 = vmatprep.mubr.f32.mxu1 %v1098_v59 }
  0xbf   : > { %777 = vmatmul.mubr.f32.gmra.mrb[56].mxu0 %v420_v56 }
  0xc0   : > { %781 = vmatprep.mubr.f32.mxu0 %v424_v57  ;;  %1447 = vmatmul.mubr.f32.gmra.mrb[82].mxu1 %v1097_v62 }
  0xc1   : > { %1451 = vmatprep.mubr.f32.mxu1 %v1101_v63 }
  0xc3   : > { %782 = vmatmul.mubr.f32.gmra.mrb[58].mxu0 %v423_v60 }
  0xc4   : > { %786 = vmatprep.mubr.f32.mxu0 %v427_v61  ;;  %1452 = vmatmul.mubr.f32.gmra.mrb[84].mxu1 %v1100_v2 }
  0xc5   : > { %1456 = vmatprep.mubr.f32.mxu1 %v1104_v4 }
  0xc7   : > { %787 = vmatmul.mubr.f32.gmra.mrb[60].mxu0 %v426_v0 }
  0xc8   : > { %791 = vmatprep.mubr.f32.mxu0 %v430_v1  ;;  %1457 = vmatmul.mubr.f32.gmra.mrb[86].mxu1 %v1103_v7 }
  0xc9   : > { %1461 = vmatprep.mubr.f32.mxu1 %v1107_v8 }
  0xcb   : > { %792 = vmatmul.mubr.f32.gmra.mrb[62].mxu0 %v429_v5  ;;  %v3103_v5 = vld [vmem:[%s3498_s4] ss:$0 sm:$0xff] }
  0xcc   : > { %2273 = vmatprep.mubr.msk.f32.mxu0 %vm475_vm0, %v1024_v6  ;;  %1462 = vmatmul.mubr.f32.gmra.mrb[88].mxu1 %v1106_v11 }
  0xcd   : > { %1466 = vmatprep.mubr.f32.mxu1 %v1110_v12 }
  0xcf   : > { %2274 = vmatmul.mubr.msk.f32.vlgmr.msra.gmra.mrb[64].mxu0 %vm475_vm0, %v1027_v9 }
  0xd0   : > { %2276 = vmatprep.mubr.msk.f32.mxu0 %vm475_vm0, %v1030_v10  ;;  %1467 = vmatmul.mubr.f32.gmra.mrb[90].mxu1 %v1109_v15 }
  0xd1   : > { %1471 = vmatprep.mubr.f32.mxu1 %v1113_v16 }
  0xd3   : > { %2277 = vmatmul.mubr.msk.f32.gmra.mrb[66].mxu0 %vm475_vm0, %v1033_v13 }
  0xd4   : > { %2279 = vmatprep.mubr.msk.f32.mxu0 %vm475_vm0, %v1036_v14  ;;  %1472 = vmatmul.mubr.f32.gmra.mrb[92].mxu1 %v1112_v19 }
  0xd5   : > { %1476 = vmatprep.mubr.f32.mxu1 %v1116_v20 }
  0xd7   : > { %2280 = vmatmul.mubr.msk.f32.gmra.mrb[68].mxu0 %vm475_vm0, %v1039_v17 }
  0xd8   : > { %2282 = vmatprep.mubr.msk.f32.mxu0 %vm475_vm0, %v1042_v18  ;;  %1477 = vmatmul.mubr.f32.gmra.mrb[94].mxu1 %v1115_v23 }
  0xdb   : > { %2283 = vmatmul.mubr.msk.f32.gmra.mrb[70].mxu0 %vm475_vm0, %v1045_v21 }
  0xdc   : > { %2285 = vmatprep.mubr.msk.f32.mxu0 %vm475_vm0, %v1048_v22 }
  0xdf   : > { %2286 = vmatmul.mubr.msk.f32.gmra.mrb[72].mxu0 %vm475_vm0, %v1051_v24 }
  0xe0   : > { %2288 = vmatprep.mubr.msk.f32.mxu0 %vm475_vm0, %v1054_v25 }
  0xe3   : > { %2289 = vmatmul.mubr.msk.f32.gmra.mrb[74].mxu0 %vm475_vm0, %v1057_v26 }
  0xe4   : > { %2291 = vmatprep.mubr.msk.f32.mxu0 %vm475_vm0, %v1060_v27 }
  0xe7   : > { %2292 = vmatmul.mubr.msk.f32.gmra.mrb[76].mxu0 %vm475_vm0, %v1063_v28 }
  0xe8   : > { %2294 = vmatprep.mubr.msk.f32.mxu0 %vm475_vm0, %v1066_v29 }
  0xeb   : > { %2295 = vmatmul.mubr.msk.f32.gmra.mrb[78].mxu0 %vm475_vm0, %v1069_v3 }
  0xec   : > { %2297 = vmatprep.mubr.msk.f32.mxu0 %vm475_vm0, %v1072_v30 }
  0xee   : > { %v2219_v36 = vpop.f32.mrb[0].mxu1 }
  0xef   : > { %2298 = vmatmul.mubr.msk.f32.gmra.mrb[80].mxu0 %vm475_vm0, %v1075_v31  ;;  %v863_v38 = vpop.f32.mrb[1].mxu1 }
  0xf0   : > { %2300 = vmatprep.mubr.msk.f32.mxu0 %vm475_vm0, %v1078_v32 }
  0xf2   : > { %v2222_v40 = vpop.f32.mrb[2].mxu1 }
  0xf3   : > { %2301 = vmatmul.mubr.msk.f32.gmra.mrb[82].mxu0 %vm475_vm0, %v1081_v33  ;;  %v873_v42 = vpop.f32.mrb[3].mxu1 }
  0xf4   : > { %2303 = vmatprep.mubr.msk.f32.mxu0 %vm475_vm0, %v1084_v34 }
  0xf6   : > { %v3053_v44 = vpop.f32.mrb[4].mxu1 }
  0xf7   : > { %2304 = vmatmul.mubr.msk.f32.gmra.mrb[84].mxu0 %vm475_vm0, %v1087_v35  ;;  %v883_v46 = vpop.f32.mrb[5].mxu1 }
  0xf8   : > { %2306 = vmatprep.mubr.msk.f32.mxu0 %vm475_vm0, %v1090_v37 }
  0xfa   : > { %v3059_v48 = vpop.f32.mrb[6].mxu1 }
  0xfb   : > { %2307 = vmatmul.mubr.msk.f32.gmra.mrb[86].mxu0 %vm475_vm0, %v1093_v39  ;;  %v3062_v50 = vpop.f32.mrb[7].mxu1 }
  0xfc   : > { %2309 = vmatprep.mubr.msk.f32.mxu0 %vm475_vm0, %v1096_v41 }
  0xfe   : > { %v3067_v52 = vpop.f32.mrb[8].mxu1 }
  0xff   : > { %2310 = vmatmul.mubr.msk.f32.gmra.mrb[88].mxu0 %vm475_vm0, %v1099_v43  ;;  %v3070_v54 = vpop.f32.mrb[9].mxu1 }
 0x100   : > { %2312 = vmatprep.mubr.msk.f32.mxu0 %vm475_vm0, %v1102_v45 }
 0x102   : > { %v3075_v56 = vpop.f32.mrb[10].mxu1 }
 0x103   : > { %2313 = vmatmul.mubr.msk.f32.gmra.mrb[90].mxu0 %vm475_vm0, %v1105_v47  ;;  %v3077_v57 = vpop.f32.mrb[11].mxu1 }
 0x104   : > { %2315 = vmatprep.mubr.msk.f32.mxu0 %vm475_vm0, %v1108_v49 }
 0x106   : > { %v3080_v58 = vpop.f32.mrb[12].mxu1 }
 0x107   : > { %2316 = vmatmul.mubr.msk.f32.gmra.mrb[92].mxu0 %vm475_vm0, %v1111_v51  ;;  %v3082_v59 = vpop.f32.mrb[13].mxu1 }
 0x108   : > { %2318 = vmatprep.mubr.msk.f32.mxu0 %vm475_vm0, %v1114_v53 }
 0x10a   : > { %v3084_v60 = vpop.f32.mrb[14].mxu1 }
 0x10b   : > { %2319 = vmatmul.mubr.msk.f32.gmra.mrb[94].mxu0 %vm475_vm0, %v1117_v55  ;;  %v3086_v61 = vpop.f32.mrb[15].mxu1 }
 0x10e   : > { %v3088_v62 = vpop.f32.mrb[16].mxu1 }
 0x10f   : > { %v3090_v63 = vpop.f32.mrb[17].mxu1 }
 0x112   : > { %v3092_v0 = vpop.f32.mrb[18].mxu1 }
 0x113   : > { %v3094_v1 = vpop.f32.mrb[19].mxu1 }
 0x116   : > { %v3096_v2 = vpop.f32.mrb[20].mxu1 }
 0x117   : > { %v3098_v4 = vpop.f32.mrb[21].mxu1 }
 0x11a   : > { %v3105_v6 = vpop.f32.mrb[22].mxu1 }
 0x11b   : > { %v3107_v7 = vpop.f32.mrb[23].mxu1 }
 0x11e   : > { %v3110_v11 = vpop.f32.mrb[24].mxu1 }
 0x11f   : > { %v3114_v13 = vpop.f32.mrb[25].mxu1 }
 0x122   : > { %v638_v8 = vpop.f32.mrb[0].mxu0  ;;  %v3117_v17 = vpop.f32.mrb[26].mxu1 }
 0x123   : > { %v639_v9 = vadd.f32 %v3103_v5, %v638_v8  ;;  %v640_v10 = vpop.f32.mrb[1].mxu0  ;;  %v3121_v19 = vpop.f32.mrb[27].mxu1 }
 0x125   : > { %v3112_v12 = vadd.f32 %v863_v38, %v639_v9 }
 0x126   : > { %v643_v14 = vpop.f32.mrb[2].mxu0  ;;  %v3124_v23 = vpop.f32.mrb[28].mxu1 }
 0x127   : > { %v644_v15 = vadd.f32 %v3103_v5, %v643_v14  ;;  %v645_v16 = vpop.f32.mrb[3].mxu0  ;;  %v3128_v25 = vpop.f32.mrb[29].mxu1 }
 0x129   : > { %v3119_v18 = vadd.f32 %v2219_v36, %v644_v15 }
 0x12a   : > { %v648_v20 = vpop.f32.mrb[4].mxu0  ;;  %v3131_v29 = vpop.f32.mrb[30].mxu1 }
 0x12b   : > { %v649_v21 = vadd.f32 %v3103_v5, %v648_v20  ;;  %v650_v22 = vpop.f32.mrb[5].mxu0  ;;  %v3135_v30 = vpop.f32.mrb[31].mxu1 }
 0x12d   : > { %v3126_v24 = vadd.f32 %v873_v42, %v649_v21 }
 0x12e   : > { %v653_v26 = vpop.f32.mrb[6].mxu0 }
 0x12f   : > { %v654_v27 = vadd.f32 %v3103_v5, %v653_v26  ;;  %v655_v28 = vpop.f32.mrb[7].mxu0  ;;  %v3138_v34 = vpop.f32.mrb[32].mxu1 }
 0x130   : > { %v1325_v36 = vpop.f32.mrb[33].mxu1 }
 0x131   : > { %v3133_v3 = vadd.f32 %v2222_v40, %v654_v27 }
 0x132   : > { %v658_v31 = vpop.f32.mrb[8].mxu0 }
 0x133   : > { %v659_v32 = vadd.f32 %v3103_v5, %v658_v31  ;;  %v660_v33 = vpop.f32.mrb[9].mxu0  ;;  %v3143_v41 = vpop.f32.mrb[34].mxu1 }
 0x134   : > { %v1330_v42 = vpop.f32.mrb[35].mxu1 }
 0x135   : > { %v3140_v35 = vadd.f32 %v883_v46, %v659_v32 }
 0x136   : > { %v663_v37 = vpop.f32.mrb[10].mxu0 }
 0x137   : > { %v664_v38 = vadd.f32 %v3103_v5, %v663_v37  ;;  %v665_v39 = vpop.f32.mrb[11].mxu0  ;;  %v3149_v49 = vpop.f32.mrb[36].mxu1 }
 0x138   : > { %v1335_v51 = vpop.f32.mrb[37].mxu1 }
 0x139   : > { %v3146_v40 = vadd.f32 %v3053_v44, %v664_v38 }
 0x13a   : > { %v668_v43 = vpop.f32.mrb[12].mxu0 }
 0x13b   : > { %v669_v45 = vadd.f32 %v3103_v5, %v668_v43  ;;  %v670_v47 = vpop.f32.mrb[13].mxu0  ;;  %v3155_v9 = vpop.f32.mrb[38].mxu1 }
 0x13c   : > { %v1340_v10 = vpop.f32.mrb[39].mxu1 }
 0x13d   : > { %v3152_v46 = vadd.f32 %v3062_v50, %v669_v45 }
 0x13e   : > { %v673_v53 = vpop.f32.mrb[14].mxu0 }
 0x13f   : > { %v674_v55 = vadd.f32 %v3103_v5, %v673_v53  ;;  %v675_v8 = vpop.f32.mrb[15].mxu0  ;;  %v3161_v20 = vpop.f32.mrb[40].mxu1 }
 0x140   : > { %v1345_v21 = vpop.f32.mrb[41].mxu1 }
 0x141   : > { %v3158_v44 = vadd.f32 %v3059_v48, %v674_v55 }
 0x142   : > { %v678_v14 = vpop.f32.mrb[16].mxu0 }
 0x143   : > { %v679_v15 = vadd.f32 %v3103_v5, %v678_v14  ;;  %v680_v16 = vpop.f32.mrb[17].mxu0  ;;  %v3167_v28 = vpop.f32.mrb[42].mxu1 }
 0x144   : > { %v1350_v31 = vpop.f32.mrb[43].mxu1 }
 0x145   : > { %v3164_v50 = vadd.f32 %v3070_v54, %v679_v15 }
 0x146   : > { %v683_v22 = vpop.f32.mrb[18].mxu0 }
 0x147   : > { %v684_v26 = vadd.f32 %v3103_v5, %v683_v22  ;;  %v685_v27 = vpop.f32.mrb[19].mxu0  ;;  %v3173_v37 = vpop.f32.mrb[44].mxu1 }
 0x148   : > { %v1355_v38 = vpop.f32.mrb[45].mxu1 }
 0x149   : > { %v3170_v48 = vadd.f32 %v3067_v52, %v684_v26 }
 0x14a   : > { %v688_v32 = vpop.f32.mrb[20].mxu0 }
 0x14b   : > { %v689_v33 = vadd.f32 %v3103_v5, %v688_v32  ;;  %v690_v36 = vpop.f32.mrb[21].mxu0  ;;  %v3179_v45 = vpop.f32.mrb[46].mxu1 }
 0x14c   : > { %v1360_v47 = vpop.f32.mrb[47].mxu1 }
 0x14d   : > { %v3176_v54 = vadd.f32 %v3077_v57, %v689_v33 }
 0x14e   : > { %v693_v39 = vpop.f32.mrb[22].mxu0 }
 0x14f   : > { %v694_v42 = vadd.f32 %v3103_v5, %v693_v39  ;;  %v695_v43 = vpop.f32.mrb[23].mxu0  ;;  %v3185_v8 = vpop.f32.mrb[48].mxu1 }
 0x150   : > { %v1365_v10 = vpop.f32.mrb[49].mxu1 }
 0x151   : > { %v3182_v52 = vadd.f32 %v3075_v56, %v694_v42 }
 0x152   : > { %v698_v51 = vpop.f32.mrb[24].mxu0 }
 0x153   : > { %v699_v53 = vadd.f32 %v3103_v5, %v698_v51  ;;  %v700_v55 = vpop.f32.mrb[25].mxu0  ;;  %v3191_v21 = vpop.f32.mrb[50].mxu1 }
 0x154   : > { %v1370_v22 = vpop.f32.mrb[51].mxu1 }
 0x155   : > { %v3188_v57 = vadd.f32 %v3082_v59, %v699_v53 }
 0x156   : > { %v703_v14 = vpop.f32.mrb[26].mxu0 }
 0x157   : > { %v704_v15 = vadd.f32 %v3103_v5, %v703_v14  ;;  %v705_v16 = vpop.f32.mrb[27].mxu0  ;;  %v3197_v32 = vpop.f32.mrb[52].mxu1 }
 0x158   : > { %v1375_v33 = vpop.f32.mrb[53].mxu1 }
 0x159   : > { %v3194_v56 = vadd.f32 %v3080_v58, %v704_v15 }
 0x15a   : > { %v708_v26 = vpop.f32.mrb[28].mxu0 }
 0x15b   : > { %v709_v27 = vadd.f32 %v3103_v5, %v708_v26  ;;  %v710_v31 = vpop.f32.mrb[29].mxu0  ;;  %v3203_v42 = vpop.f32.mrb[54].mxu1 }
 0x15c   : > { %v1380_v43 = vpop.f32.mrb[55].mxu1 }
 0x15d   : > { %v3200_v59 = vadd.f32 %v3086_v61, %v709_v27 }
 0x15e   : > { %v713_v36 = vpop.f32.mrb[30].mxu0 }
 0x15f   : > { %v714_v38 = vadd.f32 %v3103_v5, %v713_v36  ;;  %v715_v39 = vpop.f32.mrb[31].mxu0  ;;  %v3209_v55 = vpop.f32.mrb[56].mxu1 }
 0x160   : > { %v1385_v10 = vpop.f32.mrb[57].mxu1 }
 0x161   : > { %v3206_v58 = vadd.f32 %v3084_v60, %v714_v38 }
 0x162   : > { %v718_v47 = vpop.f32.mrb[32].mxu0 }
 0x163   : > { %v719_v51 = vadd.f32 %v3103_v5, %v718_v47  ;;  %v720_v53 = vpop.f32.mrb[33].mxu0  ;;  %v3215_v22 = vpop.f32.mrb[58].mxu1 }
 0x164   : > { %v1390_v26 = vpop.f32.mrb[59].mxu1 }
 0x165   : > { %v3212_v61 = vadd.f32 %v3090_v63, %v719_v51  ;;  %v1804_v63 = vld [vmem:[%s3500_s6 + $0x8] sm:$0xff] }
 0x166   : > { %v723_v14 = vpop.f32.mrb[34].mxu0  ;;  %1877 = vmatprep.mubr.f32.mxu1 %v1804_v63 }
 0x167   : > { %v724_v15 = vadd.f32 %v3103_v5, %v723_v14  ;;  %v725_v16 = vpop.f32.mrb[35].mxu0  ;;  %v3224_v36 = vpop.f32.mrb[60].mxu1 }
 0x168   : > { %v1395_v39 = vpop.f32.mrb[61].mxu1 }
 0x169   : > { %v3218_v60 = vadd.f32 %v3088_v62, %v724_v15 }
 0x16a   : > { %v728_v27 = vpop.f32.mrb[36].mxu0 }
 0x16b   : > { %v729_v31 = vadd.f32 %v3103_v5, %v728_v27  ;;  %v730_v33 = vpop.f32.mrb[37].mxu0  ;;  %v3230_v51 = vpop.f32.mrb[62].mxu1 }
 0x16c   : > { %v1400_v10 = vpop.f32.mrb[63].mxu1 }
 0x16d   : > { %v3227_v38 = vadd.f32 %v3094_v1, %v729_v31 }
 0x16e   : > { %v733_v43 = vpop.f32.mrb[38].mxu0 }
 0x16f   : > { %v734_v62 = vadd.f32 %v3103_v5, %v733_v43  ;;  %v735_v47 = vpop.f32.mrb[39].mxu0  ;;  %v3236_v26 = vpop.f32.mrb[64].mxu1 }
 0x170   : > { %v1405_v27 = vpop.f32.mrb[65].mxu1 }
 0x171   : > { %v3233_v53 = vadd.f32 %v3092_v0, %v734_v62  ;;  %v1903_v27 = vld [vmem:[%s3501_s7] sm:$0xff] }
 0x172   : > { %v738_v14 = vpop.f32.mrb[40].mxu0 }
 0x173   : > { %v739_v15 = vadd.f32 %v3103_v5, %v738_v14  ;;  %v740_v16 = vpop.f32.mrb[41].mxu0  ;;  %v3242_v39 = vpop.f32.mrb[66].mxu1 }
 0x174   : > { %v1410_v43 = vpop.f32.mrb[67].mxu1 }
 0x175   : > { %v3239_v1 = vadd.f32 %v3098_v4, %v739_v15 }
 0x176   : > { %v743_v31 = vpop.f32.mrb[42].mxu0 }
 0x177   : > { %3503 = vst [vmem:[#allocation2_spill] sm:$0xff] %v3239_v1  ;;  %v744_v33 = vadd.f32 %v3103_v5, %v743_v31  ;;  %v745_v63 = vpop.f32.mrb[43].mxu0  ;;  %v3248_v14 = vpop.f32.mrb[68].mxu1 }
 0x178   : > { %v1415_v15 = vpop.f32.mrb[69].mxu1  ;;  %v2488_v63 = vmov 0  }
 0x179   : > { %v3245_v0 = vadd.f32 %v3096_v2, %v744_v33  ;;  %v1905_v2 = vld [vmem:[%s3501_s7 + $0x10] sm:$0xff]  ;;  %2477 = vset.pattern.permute.xlu0 %v2488_v63  ;;  %2478 = vset.pattern.permute.xlu1 %v2488_v63 }
 0x17a   : > { %v748_v62 = vpop.f32.mrb[44].mxu0  ;;  %1910 = vperm.xlu0 %2477, %v1903_v27   ;;  %1920 = vperm.xlu1 %2478, %v1905_v2   ;;  %v1907_v2 = vld [vmem:[%s3501_s7 + $0x20] sm:$0x7] }
 0x17b   : > { %3504 = vst [vmem:[#allocation3_spill] sm:$0xff] %v3245_v0  ;;  %v749_v47 = vadd.f32 %v3103_v5, %v748_v62  ;;  %v750_v10 = vpop.f32.mrb[45].mxu0  ;;  %v3260_v43 = vpop.f32.mrb[70].mxu1 }
 0x17c   : > { %v1420_v62 = vpop.f32.mrb[71].mxu1  ;;  %v1906_v10 = vld [vmem:[%s3501_s7 + $0x18] sm:$0xff] }
 0x17d   : > { %v3251_v4 = vadd.f32 %v3107_v7, %v749_v47  ;;  %v1904_v47 = vld [vmem:[%s3501_s7 + $0x8] sm:$0xff] }
 0x17e   : > { %v753_v16 = vpop.f32.mrb[46].mxu0  ;;  %1915 = vperm.xlu0 %2477, %v1904_v47   ;;  %1925 = vperm.xlu1 %2478, %v1906_v10  }
 0x17f   : > { %3505 = vst [vmem:[#allocation4_spill] sm:$0xff] %v3251_v4  ;;  %v754_v31 = vadd.f32 %v3103_v5, %v753_v16  ;;  %v755_v33 = vpop.f32.mrb[47].mxu0  ;;  %v3272_v63 = vpop.f32.mrb[72].mxu1 }
 0x180   : > { %v1425_v27 = vpop.f32.mrb[73].mxu1 }
 0x181   : > { %v3263_v7 = vadd.f32 %v3105_v6, %v754_v31 }
 0x182   : > { %v758_v15 = vpop.f32.mrb[48].mxu0  ;;  %1930 = vperm.xlu0 %2477, %v1907_v2  }
 0x183   : > { %3506 = vst [vmem:[#allocation5_spill] sm:$0xff] %v3263_v7  ;;  %v759_v16 = vadd.f32 %v3103_v5, %v758_v15  ;;  %v760_v33 = vpop.f32.mrb[49].mxu0  ;;  %v3281_v7 = vpop.f32.mrb[74].mxu1 }
 0x184   : > { %v1430_v47 = vpop.f32.mrb[75].mxu1 }
 0x185   : > { %v3275_v6 = vadd.f32 %v3114_v13, %v759_v16 }
 0x186   : > { %v763_v31 = vpop.f32.mrb[50].mxu0 }
 0x187   : > { %3507 = vst [vmem:[#allocation6_spill] sm:$0xff] %v3275_v6  ;;  %v764_v62 = vadd.f32 %v3103_v5, %v763_v31  ;;  %v765_v4 = vpop.f32.mrb[51].mxu0  ;;  %v3287_v33 = vpop.f32.mrb[76].mxu1 }
 0x188   : > { %v1435_v6 = vpop.f32.mrb[77].mxu1 }
 0x189   : > { %v3284_v15 = vadd.f32 %v3110_v11, %v764_v62 }
 0x18a   : > { %v768_v10 = vpop.f32.mrb[52].mxu0 }
 0x18b   : > { %3508 = vst [vmem:[#allocation7_spill] sm:$0xff] %v3284_v15  ;;  %v769_v13 = vadd.f32 %v3103_v5, %v768_v10  ;;  %v770_v16 = vpop.f32.mrb[53].mxu0  ;;  %v3293_v0 = vpop.f32.mrb[78].mxu1 }
 0x18c   : > { %v1440_v2 = vpop.f32.mrb[79].mxu1 }
 0x18d   : > { %v3290_v27 = vadd.f32 %v3121_v19, %v769_v13 }
 0x18e   : > { %v773_v1 = vpop.f32.mrb[54].mxu0 }
 0x18f   : > { %3509 = vst [vmem:[#allocation8_spill] sm:$0xff] %v3290_v27  ;;  %v774_v4 = vadd.f32 %v3103_v5, %v773_v1  ;;  %v775_v31 = vpop.f32.mrb[55].mxu0  ;;  %v3299_v16 = vpop.f32.mrb[80].mxu1 }
 0x190   : > { %v1445_v6 = vpop.f32.mrb[81].mxu1 }
 0x191   : > { %v3296_v11 = vadd.f32 %v3117_v17, %v774_v4 }
 0x192   : > { %v778_v62 = vpop.f32.mrb[56].mxu0 }
 0x193   : > { %3510 = vst [vmem:[#allocation9_spill] sm:$0xff] %v3296_v11  ;;  %v779_v47 = vadd.f32 %v3103_v5, %v778_v62  ;;  %v780_v10 = vpop.f32.mrb[57].mxu0  ;;  %v3305_v27 = vpop.f32.mrb[82].mxu1 }
 0x194   : > { %v1450_v4 = vpop.f32.mrb[83].mxu1 }
 0x195   : > { %v3302_v19 = vadd.f32 %v3128_v25, %v779_v47 }
 0x196   : > { %v783_v13 = vpop.f32.mrb[58].mxu0 }
 0x197   : > { %3511 = vst [vmem:[#allocation10_spill] sm:$0xff] %v3302_v19  ;;  %v784_v1 = vadd.f32 %v3103_v5, %v783_v13  ;;  %v785_v31 = vpop.f32.mrb[59].mxu0  ;;  %v3311_v11 = vpop.f32.mrb[84].mxu1  ;;  %v3319_v13 = vld [vmem:[%s3499_s5] ss:$0 sm:$0xff] }
 0x198   : > { %v1455_v47 = vpop.f32.mrb[85].mxu1  ;;  %v1329_v4 = vadd.f32 %v3319_v13, %v3143_v41  ;;  %v1334_v41 = vadd.f32 %v3319_v13, %v3149_v49  ;;  %v1344_v49 = vadd.f32 %v3319_v13, %v3161_v20 }
 0x199   : > { %v3308_v17 = vadd.f32 %v3124_v23, %v784_v1 }
 0x19a   : > { %v788_v2 = vpop.f32.mrb[60].mxu0 }
 0x19b   : > { %3512 = vst [vmem:[#allocation11_spill] sm:$0xff] %v3308_v17  ;;  %v789_v62 = vadd.f32 %v3103_v5, %v788_v2  ;;  %v790_v10 = vpop.f32.mrb[61].mxu0  ;;  %v3322_v31 = vpop.f32.mrb[86].mxu1 }
 0x19d   : > { %v3314_v25 = vadd.f32 %v3135_v30, %v789_v62  ;;  %v1460_v30 = vpop.f32.mrb[87].mxu1  ;;  %v1324_v62 = vadd.f32 %v3319_v13, %v3138_v34 }
 0x19e   : > { %v793_v6 = vpop.f32.mrb[62].mxu0 }
 0x19f   : > { %3513 = vst [vmem:[#allocation12_spill] sm:$0xff] %v3314_v25  ;;  %v794_v23 = vadd.f32 %v3103_v5, %v793_v6  ;;  %v795_v1 = vpop.f32.mrb[63].mxu0  ;;  %v3331_v17 = vpop.f32.mrb[88].mxu1  ;;  %v1339_v5 = vadd.f32 %v3319_v13, %v3155_v9 }
 0x1a0   : > { %3515 = vst [vmem:[#allocation14_spill] sm:$0xff] %v3331_v17  ;;  %v1465_v1 = vpop.f32.mrb[89].mxu1 }
 0x1a1   : > { %v3327_v2 = vadd.f32 %v3131_v29, %v794_v23 }
 0x1a2   : > { %v2275_v10 = vpop.f32.mrb[64].mxu0 }
 0x1a3   : > { %3514 = vst [vmem:[#allocation13_spill] sm:$0xff] %v3327_v2  ;;  %v1554_v47 = vadd.f32 %v2275_v10, %v1329_v4  ;;  %v1548_v25 = vpop.f32.mrb[65].mxu0 }
 0x1a4   : > { %v1549_v19 = vadd.f32 %v1548_v25, %v1324_v62  ;;  %v3339_v25 = vpop.f32.mrb[90].mxu1  ;;  %v1349_v62 = vadd.f32 %v3319_v13, %v3167_v28  ;;  %v1359_v28 = vadd.f32 %v3319_v13, %v3179_v45  ;;  %v1369_v45 = vadd.f32 %v3319_v13, %v3191_v21 }
 0x1a5   : > { %v1708_v6 = vmax.f32 %v1554_v47, 0.0  ;;  %v1470_v1 = vpop.f32.mrb[91].mxu1  ;;  %v1379_v21 = vadd.f32 %v3319_v13, %v3203_v42  ;;  %v1389_v42 = vadd.f32 %v3319_v13, %v3215_v22  ;;  %v1399_v22 = vadd.f32 %v3319_v13, %v3230_v51 }
 0x1a6   : > { %v1707_v29 = vmax.f32 %v1549_v19, 0.0  ;;  %v2278_v23 = vpop.f32.mrb[66].mxu0  ;;  %v1409_v51 = vadd.f32 %v3319_v13, %v3242_v39  ;;  %v1419_v39 = vadd.f32 %v3319_v13, %v3260_v43  ;;  %v1429_v43 = vadd.f32 %v3319_v13, %v3281_v7 }
 0x1a7   : > { %v1740_v30 = vadd.f32 %v1708_v6, %v3119_v18  ;;  %v1564_v2 = vadd.f32 %v2278_v23, %v1339_v5  ;;  %v1558_v34 = vpop.f32.mrb[67].mxu0  ;;  %v3349_v23 = vpop.f32.mrb[92].mxu1 }
 0x1a8   : > { %v1739_v4 = vadd.f32 %v1707_v29, %v3112_v12  ;;  %v1559_v10 = vadd.f32 %v1558_v34, %v1334_v41  ;;  %v1475_v20 = vpop.f32.mrb[93].mxu1  ;;  %v1354_v34 = vadd.f32 %v3319_v13, %v3173_v37 }
 0x1a9   : > { %v1772_v9 = vmax.f32 %v1740_v30, 0.0  ;;  %v1710_v47 = vmax.f32 %v1564_v2, 0.0 }
 0x1aa   : > { %v1771_v19 = vmax.f32 %v1739_v4, 0.0  ;;  %v1709_v17 = vmax.f32 %v1559_v10, 0.0  ;;  %v2281_v15 = vpop.f32.mrb[68].mxu0 }
 0x1ab   : > { %v1742_v18 = vadd.f32 %v1710_v47, %v3133_v3  ;;  %v1574_v5 = vadd.f32 %v2281_v15, %v1349_v62  ;;  %v1568_v6 = vpop.f32.mrb[69].mxu0  ;;  %v3359_v1 = vpop.f32.mrb[94].mxu1 }
 0x1ac   : > { %v3346_v12 = vpack.c.bf16 %v1772_v9, %v1771_v19  ;;  %v1741_v41 = vadd.f32 %v1709_v17, %v3126_v24  ;;  %v1569_v29 = vadd.f32 %v1568_v6, %v1344_v49  ;;  %v1480_v37 = vpop.f32.mrb[95].mxu1 }
 0x1ad   : > { %v1774_v2 = vmax.f32 %v1742_v18, 0.0  ;;  %v1712_v30 = vmax.f32 %v1574_v5, 0.0  ;;  %v1364_v18 = vadd.f32 %v3319_v13, %v3185_v8  ;;  %v1374_v8 = vadd.f32 %v3319_v13, %v3197_v32 }
 0x1ae   : > { %v1773_v4 = vmax.f32 %v1741_v41, 0.0  ;;  %v1711_v3 = vmax.f32 %v1569_v29, 0.0  ;;  %v2284_v15 = vpop.f32.mrb[70].mxu0  ;;  %v1384_v32 = vadd.f32 %v3319_v13, %v3209_v55  ;;  %v1394_v55 = vadd.f32 %v3319_v13, %v3224_v36 }
 0x1af   : > { %v1744_v10 = vadd.f32 %v1712_v30, %v3146_v40  ;;  %v1584_v62 = vadd.f32 %v2284_v15, %v1359_v28  ;;  %v1578_v9 = vpop.f32.mrb[71].mxu0  ;;  %v1404_v36 = vadd.f32 %v3319_v13, %v3236_v26  ;;  %v1414_v26 = vadd.f32 %v3319_v13, %v3248_v14 }
 0x1b0   : > { %v3356_v24 = vpack.c.bf16 %v1774_v2, %v1773_v4  ;;  %v1743_v17 = vadd.f32 %v1711_v3, %v3140_v35  ;;  %v1579_v47 = vadd.f32 %v1578_v9, %v1354_v34  ;;  %v1424_v14 = vadd.f32 %v3319_v13, %v3272_v63 }
 0x1b1   : > { %v1776_v49 = vmax.f32 %v1744_v10, 0.0  ;;  %v1714_v19 = vmax.f32 %v1584_v62, 0.0 }
 0x1b2   : > { %v1775_v5 = vmax.f32 %v1743_v17, 0.0  ;;  %v1713_v40 = vmax.f32 %v1579_v47, 0.0  ;;  %v2287_v6 = vpop.f32.mrb[72].mxu0 }
 0x1b3   : > { %v1746_v41 = vadd.f32 %v1714_v19, %v3158_v44  ;;  %v1594_v29 = vadd.f32 %v2287_v6, %v1369_v45  ;;  %v1588_v28 = vpop.f32.mrb[73].mxu0 }
 0x1b4   : > { %v3366_v35 = vpack.c.bf16 %v1776_v49, %v1775_v5  ;;  %v1745_v2 = vadd.f32 %v1713_v40, %v3152_v46  ;;  %v1589_v30 = vadd.f32 %v1588_v28, %v1364_v18 }
 0x1b5   : > { %v1778_v20 = vmax.f32 %v1746_v41, 0.0  ;;  %v1716_v34 = vmax.f32 %v1594_v29, 0.0 }
 0x1b6   : > { %v1777_v4 = vmax.f32 %v1745_v2, 0.0  ;;  %v1715_v3 = vmax.f32 %v1589_v30, 0.0  ;;  %v2290_v15 = vpop.f32.mrb[74].mxu0 }
 0x1b7   : > { %v1748_v44 = vadd.f32 %v1716_v34, %v3170_v48  ;;  %v1604_v10 = vadd.f32 %v2290_v15, %v1379_v21  ;;  %v1598_v62 = vpop.f32.mrb[75].mxu0 }
 0x1b8   : > { %v3374_v9 = vpack.c.bf16 %v1778_v20, %v1777_v4  ;;  %v1747_v46 = vadd.f32 %v1715_v3, %v3164_v50  ;;  %v1599_v17 = vadd.f32 %v1598_v62, %v1374_v8 }
 0x1b9   : > { %v1780_v47 = vmax.f32 %v1748_v44, 0.0  ;;  %v1718_v45 = vmax.f32 %v1604_v10, 0.0 }
 0x1ba   : > { %v1779_v49 = vmax.f32 %v1747_v46, 0.0  ;;  %v1717_v19 = vmax.f32 %v1599_v17, 0.0  ;;  %v2293_v37 = vpop.f32.mrb[76].mxu0 }
 0x1bb   : > { %v1750_v48 = vadd.f32 %v1718_v45, %v3182_v52  ;;  %v1614_v18 = vadd.f32 %v2293_v37, %v1389_v42  ;;  %v1608_v5 = vpop.f32.mrb[77].mxu0 }
 0x1bc   : > { %v3382_v40 = vpack.c.bf16 %v1780_v47, %v1779_v49  ;;  %v1749_v50 = vadd.f32 %v1717_v19, %v3176_v54  ;;  %v1609_v6 = vadd.f32 %v1608_v5, %v1384_v32 }
 0x1bd   : > { %v1782_v41 = vmax.f32 %v1750_v48, 0.0  ;;  %v1720_v29 = vmax.f32 %v1614_v18, 0.0 }
 0x1be   : > { %v1781_v28 = vmax.f32 %v1749_v50, 0.0  ;;  %v1719_v2 = vmax.f32 %v1609_v6, 0.0  ;;  %v2296_v30 = vpop.f32.mrb[78].mxu0 }
 0x1bf   : > { %v1752_v52 = vadd.f32 %v1720_v29, %v3194_v56  ;;  %v1624_v21 = vadd.f32 %v2296_v30, %v1399_v22  ;;  %v1618_v20 = vpop.f32.mrb[79].mxu0 }
 0x1c0   : > { %v3390_v34 = vpack.c.bf16 %v1782_v41, %v1781_v28  ;;  %v1751_v54 = vadd.f32 %v1719_v2, %v3188_v57  ;;  %v1619_v8 = vadd.f32 %v1618_v20, %v1394_v55  ;;  %v1439_v20 = vadd.f32 %v3319_v13, %v3293_v0 }
 0x1c1   : > { %v1784_v4 = vmax.f32 %v1752_v52, 0.0  ;;  %v1722_v3 = vmax.f32 %v1624_v21, 0.0  ;;  %v1449_v0 = vadd.f32 %v3319_v13, %v3305_v27  ;;  %v1459_v27 = vadd.f32 %v3319_v13, %v3322_v31 }
 0x1c2   : > { %v1783_v15 = vmax.f32 %v1751_v54, 0.0  ;;  %v1721_v44 = vmax.f32 %v1619_v8, 0.0  ;;  %v2299_v10 = vpop.f32.mrb[80].mxu0  ;;  %v1434_v54 = vadd.f32 %v3319_v13, %v3287_v33  ;;  %v1444_v33 = vadd.f32 %v3319_v13, %v3299_v16 }
 0x1c3   : > { %v1754_v56 = vadd.f32 %v1722_v3, %v3206_v58  ;;  %v1634_v62 = vadd.f32 %v2299_v10, %v1409_v51  ;;  %v1628_v46 = vpop.f32.mrb[81].mxu0  ;;  %v1454_v16 = vadd.f32 %v3319_v13, %v3311_v11  ;;  %v1469_v31 = vadd.f32 %v3319_v13, %v3339_v25  ;;  %v3522_v11 = vld [vmem:[#allocation14_spill] sm:$0xff] }
 0x1c4   : > { %v3398_v17 = vpack.c.bf16 %v1784_v4, %v1783_v15  ;;  %v1753_v57 = vadd.f32 %v1721_v44, %v3200_v59  ;;  %v1629_v42 = vadd.f32 %v1628_v46, %v1404_v36  ;;  %v3516_v4 = vld [vmem:[#allocation3_spill] sm:$0xff] }
 0x1c5   : > { %v1786_v47 = vmax.f32 %v1754_v56, 0.0  ;;  %v1724_v45 = vmax.f32 %v1634_v62, 0.0 }
 0x1c6   : > { %v1785_v32 = vmax.f32 %v1753_v57, 0.0  ;;  %v1723_v49 = vmax.f32 %v1629_v42, 0.0  ;;  %v2302_v19 = vpop.f32.mrb[82].mxu0  ;;  %v3518_v42 = vld [vmem:[#allocation5_spill] sm:$0xff] }
 0x1c7   : > { %v1756_v58 = vadd.f32 %v1724_v45, %v3218_v60  ;;  %v1644_v37 = vadd.f32 %v2302_v19, %v1419_v39  ;;  %v1638_v48 = vpop.f32.mrb[83].mxu0  ;;  %v3519_v39 = vld [vmem:[#allocation4_spill] sm:$0xff] }
 0x1c8   : > { %v3406_v18 = vpack.c.bf16 %v1786_v47, %v1785_v32  ;;  %v1755_v59 = vadd.f32 %v1723_v49, %v3212_v61  ;;  %v1639_v5 = vadd.f32 %v1638_v48, %v1414_v26 }
 0x1c9   : > { %v1788_v50 = vmax.f32 %v1756_v58, 0.0  ;;  %v1726_v6 = vmax.f32 %v1644_v37, 0.0 }
 0x1ca   : > { %v1787_v41 = vmax.f32 %v1755_v59, 0.0  ;;  %v1725_v22 = vmax.f32 %v1639_v5, 0.0  ;;  %v2305_v29 = vpop.f32.mrb[84].mxu0  ;;  %v3520_v5 = vld [vmem:[#allocation7_spill] sm:$0xff] }
 0x1cb   : > { %v1758_v60 = vadd.f32 %v1726_v6, %v3233_v53  ;;  %v1654_v55 = vadd.f32 %v2305_v29, %v1429_v43  ;;  %v1648_v28 = vpop.f32.mrb[85].mxu0  ;;  %v3521_v43 = vld [vmem:[#allocation6_spill] sm:$0xff] }
 0x1cc   : > { %v1757_v2 = vadd.f32 %v1725_v22, %v3227_v38  ;;  %v1649_v30 = vadd.f32 %v1648_v28, %v1424_v14  ;;  %v2433_v61 = vpack.c.bf16 %v1788_v50, %v1787_v41  ;;  %v3517_v38 = vld [vmem:[#allocation2_spill] sm:$0xff]  ;;  %v1464_v28 = vadd.f32 %v3319_v13, %v3522_v11 }
 0x1cd   : > { %v1790_v52 = vmax.f32 %v1758_v60, 0.0  ;;  %v1728_v21 = vmax.f32 %v1654_v55, 0.0 }
 0x1ce   : > { %v1789_v7 = vmax.f32 %v1757_v2, 0.0  ;;  %v1727_v63 = vmax.f32 %v1649_v30, 0.0  ;;  %v2308_v8 = vpop.f32.mrb[86].mxu0  ;;  %2434 = vmatprep.subr.bf16.mxu1 %v2433_v61  ;;  %v3523_v61 = vld [vmem:[#allocation9_spill] sm:$0xff] }
 0x1cf   : > { %v1760_v53 = vadd.f32 %v1728_v21, %v3516_v4  ;;  %v1664_v3 = vadd.f32 %v2308_v8, %v1439_v20  ;;  %v1658_v51 = vpop.f32.mrb[87].mxu0  ;;  %2436 = vmatpush3.bf16.msra.mxu1 %v3346_v12  ;;  %v1479_v20 = vadd.f32 %v3319_v13, %v3359_v1  ;;  %v3526_v1 = vld [vmem:[#allocation10_spill] sm:$0xff] }
 0x1d0   : > { %v1759_v15 = vadd.f32 %v1727_v63, %v3517_v38  ;;  %v1659_v36 = vadd.f32 %v1658_v51, %v1434_v54  ;;  %v2437_v44 = vpack.c.bf16 %v1790_v52, %v1789_v7  ;;  %v3524_v7 = vld [vmem:[#allocation8_spill] sm:$0xff] }
 0x1d1   : > { %v1792_v10 = vmax.f32 %v1760_v53, 0.0  ;;  %v1730_v56 = vmax.f32 %v1664_v3, 0.0  ;;  %v1474_v3 = vadd.f32 %v3319_v13, %v3349_v23  ;;  %v3528_v23 = vld [vmem:[#allocation12_spill] sm:$0xff] }
 0x1d2   : > { %v1791_v62 = vmax.f32 %v1759_v15, 0.0  ;;  %v1729_v46 = vmax.f32 %v1659_v36, 0.0  ;;  %v2311_v57 = vpop.f32.mrb[88].mxu0  ;;  %2438 = vmatprep.subr.bf16.mxu1 %v2437_v44  ;;  %v3525_v15 = vld [vmem:[#allocation11_spill] sm:$0xff] }
 0x1d3   : > { %v1762_v47 = vadd.f32 %v1730_v56, %v3518_v42  ;;  %v1674_v45 = vadd.f32 %v2311_v57, %v1449_v0  ;;  %v1668_v12 = vpop.f32.mrb[89].mxu0  ;;  %2440 = vmatpush3.bf16.msra.mxu1 %v3356_v24  ;;  %v3527_v42 = vld [vmem:[#allocation13_spill] sm:$0xff] }
 0x1d4   : > { %v1761_v32 = vadd.f32 %v1729_v46, %v3519_v39  ;;  %v1669_v26 = vadd.f32 %v1668_v12, %v1444_v33  ;;  %v2441_v49 = vpack.c.bf16 %v1792_v10, %v1791_v62 }
 0x1d5   : > { %v1794_v19 = vmax.f32 %v1762_v47, 0.0  ;;  %v1732_v58 = vmax.f32 %v1674_v45, 0.0 }
 0x1d6   : > { %v1793_v37 = vmax.f32 %v1761_v32, 0.0  ;;  %v1731_v48 = vmax.f32 %v1669_v26, 0.0  ;;  %v2314_v59 = vpop.f32.mrb[90].mxu0  ;;  %2442 = vmatprep.subr.bf16.mxu1 %v2441_v49  ;;  %v1803_v32 = vld [vmem:[%s3500_s6] sm:$0xff]  ;;  %v1810_v49 = vld [vmem:[%s3500_s6 + $0x38] sm:$0xff] }
 0x1d7   : > { %v1764_v50 = vadd.f32 %v1732_v58, %v3520_v5  ;;  %v1684_v6 = vadd.f32 %v2314_v59, %v1459_v27  ;;  %v1678_v24 = vpop.f32.mrb[91].mxu0  ;;  %2444 = vmatpush3.bf16.msra.mxu1 %v3366_v35  ;;  %v1807_v26 = vld [vmem:[%s3500_s6 + $0x20] sm:$0xff]  ;;  %v1812_v58 = vld [vmem:[%s3500_s6 + $0x48] sm:$0x7] }
 0x1d8   : > { %v1763_v41 = vadd.f32 %v1731_v48, %v3521_v43  ;;  %v1679_v14 = vadd.f32 %v1678_v24, %v1454_v16  ;;  %v2445_v22 = vpack.c.bf16 %v1794_v19, %v1793_v37  ;;  %v1809_v19 = vld [vmem:[%s3500_s6 + $0x30] sm:$0xff]  ;;  %v1811_v27 = vld [vmem:[%s3500_s6 + $0x40] sm:$0x7] }
 0x1d9   : > { %v1796_v29 = vmax.f32 %v1764_v50, 0.0  ;;  %v1734_v60 = vmax.f32 %v1684_v6, 0.0 }
 0x1da   : > { %v1795_v55 = vmax.f32 %v1763_v41, 0.0  ;;  %v1733_v2 = vmax.f32 %v1679_v14, 0.0  ;;  %v2317_v30 = vpop.f32.mrb[92].mxu0  ;;  %2446 = vmatprep.subr.bf16.mxu1 %v2445_v22 }
 0x1db   : > { %v1766_v52 = vadd.f32 %v1734_v60, %v3523_v61  ;;  %v1694_v21 = vadd.f32 %v2317_v30, %v1469_v31  ;;  %v1688_v35 = vpop.f32.mrb[93].mxu0  ;;  %2448 = vmatpush3.bf16.msra.mxu1 %v3374_v9 }
 0x1dc   : > { %v1765_v54 = vadd.f32 %v1733_v2, %v3524_v7  ;;  %v1689_v63 = vadd.f32 %v1688_v35, %v1464_v28  ;;  %v2449_v25 = vpack.c.bf16 %v1796_v29, %v1795_v55 }
 0x1dd   : > { %v1798_v8 = vmax.f32 %v1766_v52, 0.0  ;;  %v1736_v4 = vmax.f32 %v1694_v21, 0.0 }
 0x1de   : > { %v1797_v53 = vmax.f32 %v1765_v54, 0.0  ;;  %v1735_v51 = vmax.f32 %v1689_v63, 0.0  ;;  %v2320_v38 = vpop.f32.mrb[94].mxu0  ;;  %2450 = vmatprep.subr.bf16.mxu1 %v2449_v25 }
 0x1df   : > { %v1768_v36 = vadd.f32 %v1736_v4, %v3525_v15  ;;  %v1704_v44 = vadd.f32 %v2320_v38, %v1479_v20  ;;  %v1698_v9 = vpop.f32.mrb[95].mxu0  ;;  %2452 = vmatpush3.bf16.msra.mxu1 %v3382_v40 }
 0x1e0   : > { %v1767_v10 = vadd.f32 %v1735_v51, %v3526_v1  ;;  %v1699_v56 = vadd.f32 %v1698_v9, %v1474_v3  ;;  %v2453_v0 = vpack.c.bf16 %v1798_v8, %v1797_v53 }
 0x1e1   : > { %v1800_v62 = vmax.f32 %v1768_v36, 0.0  ;;  %v1738_v33 = vmax.f32 %v1704_v44, 0.0 }
 0x1e2   : > { %v1799_v46 = vmax.f32 %v1767_v10, 0.0  ;;  %v1737_v57 = vmax.f32 %v1699_v56, 0.0  ;;  %2454 = vmatprep.subr.bf16.mxu1 %v2453_v0 }
 0x1e3   : > { %v1770_v13 = vadd.f32 %v1738_v33, %v3527_v42  ;;  %2456 = vmatpush3.bf16.msra.mxu1 %v3390_v34  ;;  %v1806_v34 = vld [vmem:[%s3500_s6 + $0x18] sm:$0xff] }
 0x1e4   : > { %v1769_v47 = vadd.f32 %v1737_v57, %v3528_v23  ;;  %v2457_v45 = vpack.c.bf16 %v1800_v62, %v1799_v46 }
 0x1e5   : > { %v1802_v12 = vmax.f32 %v1770_v13, 0.0 }
 0x1e6   : > { %v1801_v39 = vmax.f32 %v1769_v47, 0.0  ;;  %2458 = vmatprep.subr.bf16.mxu1 %v2457_v45 }
 0x1e7   : > { %2460 = vmatpush3.bf16.msra.mxu1 %v3398_v17  ;;  %v1805_v17 = vld [vmem:[%s3500_s6 + $0x10] sm:$0xff] }
 0x1e8   : > { %v2461_v40 = vpack.c.bf16 %v1802_v12, %v1801_v39 }
 0x1ea   : > { %2462 = vmatprep.subr.bf16.mxu1 %v2461_v40 }
 0x1eb   : > { %2464 = vmatpush3.bf16.msra.mxu1 %v3406_v18  ;;  %v1808_v18 = vld [vmem:[%s3500_s6 + $0x28] sm:$0xff] }
 0x1ee   : > { %1878 = vmatmul.mubr.f32.vlgmr.msra.gmra.mrb[96].mxu1 %v1803_v32 }
 0x1ef   : > { %1882 = vmatprep.mubr.f32.mxu1 %v1806_v34 }
 0x1f2   : > { %1883 = vmatmul.mubr.f32.gmra.mrb[98].mxu1 %v1805_v17 }
 0x1f3   : > { %1887 = vmatprep.mubr.f32.mxu1 %v1808_v18 }
 0x1f6   : > { %1888 = vmatmul.mubr.f32.gmra.mrb[100].mxu1 %v1807_v26 }
 0x1f7   : > { %1892 = vmatprep.mubr.f32.mxu1 %v1810_v49 }
 0x1f9   : > { %v1911_v37 = vpop.permute.xlu0 %1910  ;;  %v1921_v41 = vpop.permute.xlu1 %1920 }
 0x1fa   : > { %1893 = vmatmul.mubr.f32.gmra.mrb[102].mxu1 %v1809_v19 }
 0x1fb   : > { %1897 = vmatprep.mubr.f32.mxu1 %v1812_v58 }
 0x1fd   : > { %v1916_v24 = vpop.permute.xlu0 %1915  ;;  %v1926_v28 = vpop.permute.xlu1 %1925 }
 0x1fe   : > { %1898 = vmatmul.mubr.f32.gmra.mrb[104].mxu1 %v1811_v27 }
 0x201   : > { %v1931_v35 = vpop.permute.xlu0 %1930 }
 0x2c1   : > { %v2194_v16 = vpop.f32.mrb[96].mxu1 }
 0x2c2   : > { %v2195_v48 = vpop.f32.mrb[97].mxu1 }
 0x2c3   : > { %v2196_v59 = vadd.f32 %v2195_v48, %v2194_v16 }
 0x2c5   : > { %v1933_v5 = vmul.f32 %v2196_v59, %v1911_v37  ;;  %v2197_v50 = vpop.f32.mrb[98].mxu1 }
 0x2c6   : > { %v2198_v6 = vpop.f32.mrb[99].mxu1 }
 0x2c7   : > { %1939 = vst.msk [vmem:[%s335_s18] sm:$0xff] %vm1938_vm1, %v1933_v5  ;;  %v2199_v43 = vadd.f32 %v2198_v6, %v2197_v50 }
 0x2c9   : > { %v2200_v14 = vpop.f32.mrb[100].mxu1  ;;  %v1934_v22 = vmul.f32 %v2199_v43, %v1916_v24 }
 0x2ca   : > { %v2201_v29 = vpop.f32.mrb[101].mxu1 }
 0x2cb   : > { %v2202_v60 = vadd.f32 %v2201_v29, %v2200_v14  ;;  %1940 = vst.msk [vmem:[%s335_s18 + $0x8] sm:$0xff] %vm1938_vm1, %v1934_v22 }
 0x2cd   : > { %v2203_v31 = vpop.f32.mrb[102].mxu1  ;;  %v1935_v55 = vmul.f32 %v2202_v60, %v1921_v41 }
 0x2ce   : > { %v2204_v11 = vpop.f32.mrb[103].mxu1 }
 0x2cf   : > { %v2205_v2 = vadd.f32 %v2204_v11, %v2203_v31  ;;  %1941 = vst.msk [vmem:[%s335_s18 + $0x10] sm:$0xff] %vm1938_vm1, %v1935_v55 }
 0x2d1   : > { %v2206_v30 = vpop.f32.mrb[104].mxu1  ;;  %v1936_v61 = vmul.f32 %v2205_v2, %v1926_v28 }
 0x2d2   : > { %v2207_v52 = vpop.f32.mrb[105].mxu1 }
 0x2d3   : > { %v2208_v21 = vadd.f32 %v2207_v52, %v2206_v30  ;;  %1942 = vst.msk [vmem:[%s335_s18 + $0x18] sm:$0xff] %vm1938_vm1, %v1936_v61 }
 0x2d5   : > { %v1937_v20 = vmul.f32 %v2208_v21, %v1931_v35 }
 0x2d7   : > { %1944 = vst.msk [vmem:[%s335_s18 + $0x20] sm:$0x7] %vm1943_vm2, %v1937_v20 }
 0x2d8 PF: > { %s18_s27 = sadd.s32 1, %s2485_s27  }
 0x2d9   : > { %p15_p5 = scmp.ge.s32.totalorder %s18_s27, 4  }
 0x2db   :  { %17 = sbr.rel (!%p15_p5) target bundleno = 1 (0x1), region = 85 }

</bundles_post_ra>
